<compile_context>
chip_gen: v7x
topology: tpu7x:2x2x1
jax: 0.10.0
libtpu: 0.0.40
codegen_flags: <defaults>
</compile_context>

<pallas_src>
import functools

import jax
import jax.numpy as jnp
from jax.experimental import pallas as pl
from jax.experimental.pallas import tpu as pltpu


def _round_up(n, m):
    return (n + m - 1) // m * m


# ---------------------------- slab layouts ------------------------------------


def _weight_offsets(H, F_in):
    """Row offsets inside the (rows, 4H) weight slab. Big blocks 8-aligned."""
    o = {}
    r = 0
    o["whh0"] = r; r += H                    # (H, 4H)
    o["w1"] = r;   r += 2 * H                # (2H, 4H) = [wih1 ; whh1]
    o["fcw"] = r;  r += 2 * H                # (2H, OUT) in lanes [0:OUT)
    o["wih0"] = r; r += _round_up(F_in, 8)   # (F_in, 4H)
    o["misc"] = r; r += 8                    # b0, b1, emb_w, emb_b, fc_b rows
    o["rows"] = r
    return o


def _act_offsets(T, B):
    """Row offsets inside the (rows, max(H,F_in)) activation slab."""
    a = {}
    r = 0
    a["hist"] = r; r += T * B     # time-major history, lanes [0:F_in)
    a["h0"] = r;   r += 2 * B     # layer-0 then layer-1 initial hidden
    a["c0"] = r;   r += 2 * B     # layer-0 then layer-1 initial cell
    a["inf"] = r;  r += B         # inflation in lane 0
    a["rows"] = r
    return a


# ------------------------------- kernel ---------------------------------------


def _actor_kernel(w_ref, act_ref, o_ref, *, T, B, H, F_in, OUT):
    """Fully-fused 2-layer-LSTM Actor forward (eval semantics)."""
    f32 = jnp.float32
    ow = _weight_offsets(H, F_in)
    oa = _act_offsets(T, B)

    # ---- weights needed for layer 0 (loaded near use) ----
    wih0 = w_ref[ow["wih0"]:ow["wih0"] + F_in, :]             # (F_in, 4H)
    whh0 = w_ref[ow["whh0"]:ow["whh0"] + H, :]                # (H, 4H)
    b0 = w_ref[ow["misc"] + 0:ow["misc"] + 1, :]              # (1, 4H)

    # ---- activations ----
    hist = act_ref[oa["hist"]:oa["hist"] + T * B, 0:F_in]     # (T*B, F_in), time-major
    hA = act_ref[oa["h0"] + 0 * B:oa["h0"] + 1 * B, 0:H]      # layer-0 h
    hB = act_ref[oa["h0"] + 1 * B:oa["h0"] + 2 * B, 0:H]      # layer-1 h
    cA = act_ref[oa["c0"] + 0 * B:oa["c0"] + 1 * B, 0:H]      # layer-0 c
    cB = act_ref[oa["c0"] + 1 * B:oa["c0"] + 2 * B, 0:H]      # layer-1 c

    # ---- hoisted layer-0 input projection for the whole sequence ----
    # One dense matmul; per-step slices below are contiguous, sublane-aligned
    # views (time-major), so nothing gets relaid out inside the recurrence.
    xp0 = jnp.dot(hist, wih0, preferred_element_type=f32) + b0   # (T*B, 4H)

    # ---- layer-1 fused weights ----
    w1 = w_ref[ow["w1"]:ow["w1"] + 2 * H, :]                  # (2H, 4H) = [wih1; whh1]
    b1 = w_ref[ow["misc"] + 1:ow["misc"] + 2, :]              # (1, 4H)

    def gate_update(gates, c):
        # Full-vreg transcendentals (one sigmoid + one tanh sweep over (B,4H)),
        # slices taken afterwards.  Gate order i, f, g, o.
        sig = jax.nn.sigmoid(gates)
        tnh = jnp.tanh(gates)
        i_g = sig[:, 0 * H:1 * H]
        f_g = sig[:, 1 * H:2 * H]
        g_g = tnh[:, 2 * H:3 * H]
        o_g = sig[:, 3 * H:4 * H]
        c_new = f_g * c + i_g * g_g
        h_new = o_g * jnp.tanh(c_new)
        return h_new, c_new

    def step0(t, h, c):
        gates = xp0[t * B:(t + 1) * B, :] + jnp.dot(
            h, whh0, preferred_element_type=f32)
        return gate_update(gates, c)

    def step1(x_in, h, c):
        # Input + recurrent projections fused into one K=2H matmul.
        xz = jnp.concatenate([x_in, h], axis=1)               # (B, 2H)
        gates = jnp.dot(xz, w1, preferred_element_type=f32) + b1
        return gate_update(gates, c)

    # ---- wavefront over the two layers: layer-0 step t and layer-1 step t-1
    # are independent chains emitted back-to-back (scheduler overlaps them). ----
    # TODO(synk): inter-layer dropout (p=0.1, training mode) skipped — eval semantics.
    hA, cA = step0(0, hA, cA)
    for t in range(1, T):                                     # static unroll
        hA_prev = hA
        hA, cA = step0(t, hA, cA)
        hB, cB = step1(hA_prev, hB, cB)
    hB, cB = step1(hA, hB, cB)                                # layer-1 last step

    # ---- embedding branch: relu(inflation @ W_emb + b). K == 1 -> pure VPU
    # broadcast multiply-add, no MXU push. ----
    infl = act_ref[oa["inf"]:oa["inf"] + B, 0:1]              # (B, 1)
    emb_w = w_ref[ow["misc"] + 2:ow["misc"] + 3, 0:H]         # (1, H)
    emb_b = w_ref[ow["misc"] + 3:ow["misc"] + 4, 0:H]         # (1, H)
    emb = jnp.maximum(infl * emb_w + emb_b, 0.0)              # (B, H)

    # ---- head: tanh(fc(cat([emb, relu(h_last)], 1))) as ONE matmul ----
    hist_last = jnp.maximum(hB, 0.0)                          # (B, H)
    feat = jnp.concatenate([emb, hist_last], axis=1)          # (B, 2H)
    fcw = w_ref[ow["fcw"]:ow["fcw"] + 2 * H, 0:OUT]           # (2H, OUT)
    fc_b = w_ref[ow["misc"] + 4:ow["misc"] + 5, 0:OUT]        # (1, OUT)
    out = jnp.tanh(jnp.dot(feat, fcw, preferred_element_type=f32) + fc_b)
    o_ref[...] = out.astype(o_ref.dtype)


# ------------------------------- wrapper --------------------------------------


def pack_weights(params, H, F_in, OUT):
    """Pack every parameter into one (rows, 4H) f32 slab (single DMA)."""
    fourH = 4 * H
    o = _weight_offsets(H, F_in)
    slab = jnp.zeros((o["rows"], fourH), jnp.float32)
    slab = slab.at[o["whh0"]:o["whh0"] + H, :].set(params["whh0"])
    slab = slab.at[o["w1"]:o["w1"] + H, :].set(params["wih1"])
    slab = slab.at[o["w1"] + H:o["w1"] + 2 * H, :].set(params["whh1"])
    slab = slab.at[o["fcw"]:o["fcw"] + 2 * H, 0:OUT].set(params["fc_w"])
    slab = slab.at[o["wih0"]:o["wih0"] + F_in, :].set(params["wih0"])
    m = o["misc"]
    slab = slab.at[m + 0, :].set(params["b0"])
    slab = slab.at[m + 1, :].set(params["b1"])
    slab = slab.at[m + 2, 0:H].set(params["emb_w"].reshape(H))
    slab = slab.at[m + 3, 0:H].set(params["emb_b"].reshape(H))
    slab = slab.at[m + 4, 0:OUT].set(params["fc_b"])
    return slab


def pack_activations(inflation, past_prices, past_inflation, h0, c0, H):
    """Pack inflation, time-major history and h0/c0 into one slab (single DMA)."""
    B, T, f1 = past_prices.shape
    f2 = past_inflation.shape[2]
    F_in = f1 + f2
    a = _act_offsets(T, B)
    W = max(H, F_in)
    hist = jnp.concatenate([past_prices, past_inflation], axis=2)    # (B,T,F)
    hist_tm = jnp.transpose(hist, (1, 0, 2)).reshape(T * B, F_in)    # time-major
    slab = jnp.zeros((a["rows"], W), jnp.float32)
    slab = slab.at[a["hist"]:a["hist"] + T * B, 0:F_in].set(hist_tm)
    slab = slab.at[a["h0"]:a["h0"] + 2 * B, 0:H].set(h0.reshape(2 * B, H))
    slab = slab.at[a["c0"]:a["c0"] + 2 * B, 0:H].set(c0.reshape(2 * B, H))
    slab = slab.at[a["inf"]:a["inf"] + B, 0:1].set(inflation)
    return slab


def actor_forward(params, state, h0, c0):
    inflation, past_prices, past_inflation = state
    B, T, f1 = past_prices.shape
    f2 = past_inflation.shape[2]
    F_in = f1 + f2
    H = params["whh0"].shape[0]
    OUT = params["fc_w"].shape[1]
    assert h0.shape[0] == 2 and c0.shape[0] == 2, (
        "wavefront-interleaved kernel is specialized to num_layers=2")

    # Wrapper-side packing is pure layout plumbing (in production the weight
    # slab would be packed once and cached).
    w_slab = pack_weights(params, H, F_in, OUT)
    a_slab = pack_activations(inflation, past_prices, past_inflation, h0, c0, H)

    vmem = pl.BlockSpec(memory_space=pltpu.MemorySpace.VMEM)
    kernel = functools.partial(_actor_kernel, T=T, B=B, H=H, F_in=F_in, OUT=OUT)
    # TODO(synk): once batch grows, add a batch grid axis with
    # dimension_semantics=("parallel",) to use both TensorCores on v7x.
    return pl.pallas_call(
        kernel,
        out_shape=jax.ShapeDtypeStruct((B, OUT), jnp.float32),
        in_specs=[vmem, vmem],
        out_specs=vmem,
    )(w_slab, a_slab)


# --------------------------- pure-JAX reference -------------------------------


def actor_reference(params, state, h0, c0, num_layers):
    inflation, past_prices, past_inflation = state
    history = jnp.concatenate([past_prices, past_inflation], axis=2)
    H = params["whh0"].shape[0]
    emb = jax.nn.relu(inflation @ params["emb_w"] + params["emb_b"])
    x = history
    for l in range(num_layers):
        wih, whh, b = params[f"wih{l}"], params[f"whh{l}"], params[f"b{l}"]
        h, c = h0[l], c0[l]
        outs = []
        for t in range(x.shape[1]):
            g = x[:, t, :] @ wih + h @ whh + b
            i_g = jax.nn.sigmoid(g[:, :H])
            f_g = jax.nn.sigmoid(g[:, H:2 * H])
            g_g = jnp.tanh(g[:, 2 * H:3 * H])
            o_g = jax.nn.sigmoid(g[:, 3 * H:])
            c = f_g * c + i_g * g_g
            h = o_g * jnp.tanh(c)
            outs.append(h)
        x = jnp.stack(outs, axis=1)
    hist_last = jax.nn.relu(x[:, -1, :])
    feat = jnp.concatenate([emb, hist_last], axis=1)
    return jnp.tanh(feat @ params["fc_w"] + params["fc_b"])


# ------------------------------- params ---------------------------------------


def init_params(key, input_size, hidden_size, output_size, num_layers):
    params = {}
    ks = jax.random.split(key, 4 + 3 * num_layers)
    k = 1.0 / jnp.sqrt(hidden_size)
    k_emb = 1.0  # 1/sqrt(in_features=1)

    # embedding: Linear(1, H)
    params["emb_w"] = jax.random.uniform(
        ks[0], (1, hidden_size), jnp.float32, -k_emb, k_emb)
    params["emb_b"] = jax.random.uniform(
        ks[1], (hidden_size,), jnp.float32, -k_emb, k_emb)

    # LSTM layers; torch combines b_ih + b_hh -> folded into one bias per layer
    for l in range(num_layers):
        din = input_size if l == 0 else hidden_size
        params[f"wih{l}"] = jax.random.uniform(
            ks[2 + 3 * l], (din, 4 * hidden_size), jnp.float32, -k, k)
        params[f"whh{l}"] = jax.random.uniform(
            ks[3 + 3 * l], (hidden_size, 4 * hidden_size), jnp.float32, -k, k)
        params[f"b{l}"] = jax.random.uniform(
            ks[4 + 3 * l], (4 * hidden_size,), jnp.float32, -k, k)

    # fc: Linear(2H, output_size)
    params["fc_w"] = jax.random.uniform(
        ks[-2], (2 * hidden_size, output_size), jnp.float32, -k, k)
    params["fc_b"] = jax.random.uniform(
        ks[-1], (output_size,), jnp.float32, -k, k)
    return params


# -------------------------------- main -----------------------------------------


if __name__ == "__main__":
    # B=8 fills all 8 sublanes of every vreg (free throughput vs. B=2 at the
    # same kernel latency); T, H, OUT kept small.
    B, T = 8, 8
    F_PRICES, F_INFL = 4, 2
    INPUT_SIZE = F_PRICES + F_INFL
    HIDDEN = 32
    OUTPUT = 4
    NUM_LAYERS = 2

    key = jax.random.PRNGKey(0)
    k_in, k_pp, k_pi, k_h, k_c, k_par = jax.random.split(key, 6)

    inflation = jax.random.normal(k_in, (B, 1), jnp.float32)
    past_prices = jax.random.normal(k_pp, (B, T, F_PRICES), jnp.float32)
    past_inflation = jax.random.normal(k_pi, (B, T, F_INFL), jnp.float32)

    # torch.randn initial hidden/cell states (made deterministic here)
    h0 = jax.random.normal(k_h, (NUM_LAYERS, B, HIDDEN), jnp.float32)
    c0 = jax.random.normal(k_c, (NUM_LAYERS, B, HIDDEN), jnp.float32)

    params = init_params(k_par, INPUT_SIZE, HIDDEN, OUTPUT, NUM_LAYERS)
    state = (inflation, past_prices, past_inflation)

    fwd = jax.jit(actor_forward)
    out = jax.block_until_ready(fwd(params, state, h0, c0))
    assert out.shape == (B, OUTPUT), out.shape

    ref = actor_reference(params, state, h0, c0, NUM_LAYERS)
    assert jnp.allclose(out, ref, rtol=1e-5, atol=5e-5), (
        float(jnp.max(jnp.abs(out - ref))))

    print("KERNEL_OK")
</pallas_src>

<mosaic_0001>
module attributes {stable_mosaic.version = 11 : i64} {
  func.func @_actor_kernel(%arg0: memref<176x128xf32, #tpu.memory_space<vmem>>, %arg1: memref<104x32xf32, #tpu.memory_space<vmem>>, %arg2: memref<8x4xf32, #tpu.memory_space<vmem>>) attributes {dimension_semantics = [], scalar_prefetch = 0 : i64, scratch_operands = 0 : i64, tpu.core_type = #tpu.core_type<tc>} {
    %c160 = arith.constant 160 : index
    %c0 = arith.constant 0 : index
    %0 = vector.load %arg0[%c160, %c0] : memref<176x128xf32, #tpu.memory_space<vmem>>, vector<6x128xf32>
    %c0_0 = arith.constant 0 : index
    %c0_1 = arith.constant 0 : index
    %1 = vector.load %arg0[%c0_0, %c0_1] : memref<176x128xf32, #tpu.memory_space<vmem>>, vector<32x128xf32>
    %c168 = arith.constant 168 : index
    %c0_2 = arith.constant 0 : index
    %2 = vector.load %arg0[%c168, %c0_2] : memref<176x128xf32, #tpu.memory_space<vmem>>, vector<1x128xf32>
    %c0_3 = arith.constant 0 : index
    %c0_4 = arith.constant 0 : index
    %3 = vector.load %arg1[%c0_3, %c0_4] : memref<104x32xf32, #tpu.memory_space<vmem>>, vector<64x6xf32>
    %c64 = arith.constant 64 : index
    %c0_5 = arith.constant 0 : index
    %4 = vector.load %arg1[%c64, %c0_5] : memref<104x32xf32, #tpu.memory_space<vmem>>, vector<8x32xf32>
    %c72 = arith.constant 72 : index
    %c0_6 = arith.constant 0 : index
    %5 = vector.load %arg1[%c72, %c0_6] : memref<104x32xf32, #tpu.memory_space<vmem>>, vector<8x32xf32>
    %c80 = arith.constant 80 : index
    %c0_7 = arith.constant 0 : index
    %6 = vector.load %arg1[%c80, %c0_7] : memref<104x32xf32, #tpu.memory_space<vmem>>, vector<8x32xf32>
    %c88 = arith.constant 88 : index
    %c0_8 = arith.constant 0 : index
    %7 = vector.load %arg1[%c88, %c0_8] : memref<104x32xf32, #tpu.memory_space<vmem>>, vector<8x32xf32>
    %cst = arith.constant dense<0.000000e+00> : vector<64x128xf32>
    %8 = tpu.matmul %3, %0, %cst {dimension_numbers = #tpu.dot_dimension_numbers<[1], [0], [0], [1], [0, 0, 1, 1], [], []>} : vector<64x6xf32>, vector<6x128xf32>, vector<64x128xf32> -> vector<64x128xf32>
    %9 = vector.broadcast %2 : vector<1x128xf32> to vector<64x128xf32>
    %10 = arith.addf %8, %9 : vector<64x128xf32>
    %c32 = arith.constant 32 : index
    %c0_9 = arith.constant 0 : index
    %11 = vector.load %arg0[%c32, %c0_9] : memref<176x128xf32, #tpu.memory_space<vmem>>, vector<64x128xf32>
    %c169 = arith.constant 169 : index
    %c0_10 = arith.constant 0 : index
    %12 = vector.load %arg0[%c169, %c0_10] : memref<176x128xf32, #tpu.memory_space<vmem>>, vector<1x128xf32>
    %13 = vector.extract_strided_slice %10 {offsets = [0, 0], sizes = [8, 128], strides = [1, 1]} : vector<64x128xf32> to vector<8x128xf32>
    %cst_11 = arith.constant dense<0.000000e+00> : vector<8x128xf32>
    %14 = tpu.matmul %4, %1, %cst_11 {dimension_numbers = #tpu.dot_dimension_numbers<[1], [0], [0], [1], [0, 0, 1, 1], [], []>} : vector<8x32xf32>, vector<32x128xf32>, vector<8x128xf32> -> vector<8x128xf32>
    %15 = arith.addf %13, %14 : vector<8x128xf32>
    %16 = arith.negf %15 : vector<8x128xf32>
    %17 = math.exp %16 : vector<8x128xf32>
    %cst_12 = arith.constant 1.000000e+00 : f32
    %18 = vector.broadcast %cst_12 : f32 to vector<8x128xf32>
    %19 = arith.addf %18, %17 : vector<8x128xf32>
    %20 = arith.divf %18, %19 : vector<8x128xf32>
    %21 = math.tanh %15 : vector<8x128xf32>
    %22 = vector.extract_strided_slice %20 {offsets = [0, 0], sizes = [8, 32], strides = [1, 1]} : vector<8x128xf32> to vector<8x32xf32>
    %23 = vector.extract_strided_slice %20 {offsets = [0, 32], sizes = [8, 32], strides = [1, 1]} : vector<8x128xf32> to vector<8x32xf32>
    %24 = vector.extract_strided_slice %21 {offsets = [0, 64], sizes = [8, 32], strides = [1, 1]} : vector<8x128xf32> to vector<8x32xf32>
    %25 = vector.extract_strided_slice %20 {offsets = [0, 96], sizes = [8, 32], strides = [1, 1]} : vector<8x128xf32> to vector<8x32xf32>
    %26 = arith.mulf %23, %6 : vector<8x32xf32>
    %27 = arith.mulf %22, %24 : vector<8x32xf32>
    %28 = arith.addf %26, %27 : vector<8x32xf32>
    %29 = math.tanh %28 : vector<8x32xf32>
    %30 = arith.mulf %25, %29 : vector<8x32xf32>
    %31 = vector.extract_strided_slice %10 {offsets = [8, 0], sizes = [8, 128], strides = [1, 1]} : vector<64x128xf32> to vector<8x128xf32>
    %cst_13 = arith.constant dense<0.000000e+00> : vector<8x128xf32>
    %32 = tpu.matmul %30, %1, %cst_13 {dimension_numbers = #tpu.dot_dimension_numbers<[1], [0], [0], [1], [0, 0, 1, 1], [], []>} : vector<8x32xf32>, vector<32x128xf32>, vector<8x128xf32> -> vector<8x128xf32>
    %33 = arith.addf %31, %32 : vector<8x128xf32>
    %34 = arith.negf %33 : vector<8x128xf32>
    %35 = math.exp %34 : vector<8x128xf32>
    %cst_14 = arith.constant 1.000000e+00 : f32
    %36 = vector.broadcast %cst_14 : f32 to vector<8x128xf32>
    %37 = arith.addf %36, %35 : vector<8x128xf32>
    %38 = arith.divf %36, %37 : vector<8x128xf32>
    %39 = math.tanh %33 : vector<8x128xf32>
    %40 = vector.extract_strided_slice %38 {offsets = [0, 0], sizes = [8, 32], strides = [1, 1]} : vector<8x128xf32> to vector<8x32xf32>
    %41 = vector.extract_strided_slice %38 {offsets = [0, 32], sizes = [8, 32], strides = [1, 1]} : vector<8x128xf32> to vector<8x32xf32>
    %42 = vector.extract_strided_slice %39 {offsets = [0, 64], sizes = [8, 32], strides = [1, 1]} : vector<8x128xf32> to vector<8x32xf32>
    %43 = vector.extract_strided_slice %38 {offsets = [0, 96], sizes = [8, 32], strides = [1, 1]} : vector<8x128xf32> to vector<8x32xf32>
    %44 = arith.mulf %41, %28 : vector<8x32xf32>
    %45 = arith.mulf %40, %42 : vector<8x32xf32>
    %46 = arith.addf %44, %45 : vector<8x32xf32>
    %47 = math.tanh %46 : vector<8x32xf32>
    %48 = arith.mulf %43, %47 : vector<8x32xf32>
    %49 = tpu.concatenate %30, %5 in 1 : vector<8x32xf32>, vector<8x32xf32> -> vector<8x64xf32>
    %cst_15 = arith.constant dense<0.000000e+00> : vector<8x128xf32>
    %50 = tpu.matmul %49, %11, %cst_15 {dimension_numbers = #tpu.dot_dimension_numbers<[1], [0], [0], [1], [0, 0, 1, 1], [], []>} : vector<8x64xf32>, vector<64x128xf32>, vector<8x128xf32> -> vector<8x128xf32>
    %51 = vector.broadcast %12 : vector<1x128xf32> to vector<8x128xf32>
    %52 = arith.addf %50, %51 : vector<8x128xf32>
    %53 = arith.negf %52 : vector<8x128xf32>
    %54 = math.exp %53 : vector<8x128xf32>
    %cst_16 = arith.constant 1.000000e+00 : f32
    %55 = vector.broadcast %cst_16 : f32 to vector<8x128xf32>
    %56 = arith.addf %55, %54 : vector<8x128xf32>
    %57 = arith.divf %55, %56 : vector<8x128xf32>
    %58 = math.tanh %52 : vector<8x128xf32>
    %59 = vector.extract_strided_slice %57 {offsets = [0, 0], sizes = [8, 32], strides = [1, 1]} : vector<8x128xf32> to vector<8x32xf32>
    %60 = vector.extract_strided_slice %57 {offsets = [0, 32], sizes = [8, 32], strides = [1, 1]} : vector<8x128xf32> to vector<8x32xf32>
    %61 = vector.extract_strided_slice %58 {offsets = [0, 64], sizes = [8, 32], strides = [1, 1]} : vector<8x128xf32> to vector<8x32xf32>
    %62 = vector.extract_strided_slice %57 {offsets = [0, 96], sizes = [8, 32], strides = [1, 1]} : vector<8x128xf32> to vector<8x32xf32>
    %63 = arith.mulf %60, %7 : vector<8x32xf32>
    %64 = arith.mulf %59, %61 : vector<8x32xf32>
    %65 = arith.addf %63, %64 : vector<8x32xf32>
    %66 = math.tanh %65 : vector<8x32xf32>
    %67 = arith.mulf %62, %66 : vector<8x32xf32>
    %68 = vector.extract_strided_slice %10 {offsets = [16, 0], sizes = [8, 128], strides = [1, 1]} : vector<64x128xf32> to vector<8x128xf32>
    %cst_17 = arith.constant dense<0.000000e+00> : vector<8x128xf32>
    %69 = tpu.matmul %48, %1, %cst_17 {dimension_numbers = #tpu.dot_dimension_numbers<[1], [0], [0], [1], [0, 0, 1, 1], [], []>} : vector<8x32xf32>, vector<32x128xf32>, vector<8x128xf32> -> vector<8x128xf32>
    %70 = arith.addf %68, %69 : vector<8x128xf32>
    %71 = arith.negf %70 : vector<8x128xf32>
    %72 = math.exp %71 : vector<8x128xf32>
    %cst_18 = arith.constant 1.000000e+00 : f32
    %73 = vector.broadcast %cst_18 : f32 to vector<8x128xf32>
    %74 = arith.addf %73, %72 : vector<8x128xf32>
    %75 = arith.divf %73, %74 : vector<8x128xf32>
    %76 = math.tanh %70 : vector<8x128xf32>
    %77 = vector.extract_strided_slice %75 {offsets = [0, 0], sizes = [8, 32], strides = [1, 1]} : vector<8x128xf32> to vector<8x32xf32>
    %78 = vector.extract_strided_slice %75 {offsets = [0, 32], sizes = [8, 32], strides = [1, 1]} : vector<8x128xf32> to vector<8x32xf32>
    %79 = vector.extract_strided_slice %76 {offsets = [0, 64], sizes = [8, 32], strides = [1, 1]} : vector<8x128xf32> to vector<8x32xf32>
    %80 = vector.extract_strided_slice %75 {offsets = [0, 96], sizes = [8, 32], strides = [1, 1]} : vector<8x128xf32> to vector<8x32xf32>
    %81 = arith.mulf %78, %46 : vector<8x32xf32>
    %82 = arith.mulf %77, %79 : vector<8x32xf32>
    %83 = arith.addf %81, %82 : vector<8x32xf32>
    %84 = math.tanh %83 : vector<8x32xf32>
    %85 = arith.mulf %80, %84 : vector<8x32xf32>
    %86 = tpu.concatenate %48, %67 in 1 : vector<8x32xf32>, vector<8x32xf32> -> vector<8x64xf32>
    %cst_19 = arith.constant dense<0.000000e+00> : vector<8x128xf32>
    %87 = tpu.matmul %86, %11, %cst_19 {dimension_numbers = #tpu.dot_dimension_numbers<[1], [0], [0], [1], [0, 0, 1, 1], [], []>} : vector<8x64xf32>, vector<64x128xf32>, vector<8x128xf32> -> vector<8x128xf32>
    %88 = vector.broadcast %12 : vector<1x128xf32> to vector<8x128xf32>
    %89 = arith.addf %87, %88 : vector<8x128xf32>
    %90 = arith.negf %89 : vector<8x128xf32>
    %91 = math.exp %90 : vector<8x128xf32>
    %cst_20 = arith.constant 1.000000e+00 : f32
    %92 = vector.broadcast %cst_20 : f32 to vector<8x128xf32>
    %93 = arith.addf %92, %91 : vector<8x128xf32>
    %94 = arith.divf %92, %93 : vector<8x128xf32>
    %95 = math.tanh %89 : vector<8x128xf32>
    %96 = vector.extract_strided_slice %94 {offsets = [0, 0], sizes = [8, 32], strides = [1, 1]} : vector<8x128xf32> to vector<8x32xf32>
    %97 = vector.extract_strided_slice %94 {offsets = [0, 32], sizes = [8, 32], strides = [1, 1]} : vector<8x128xf32> to vector<8x32xf32>
    %98 = vector.extract_strided_slice %95 {offsets = [0, 64], sizes = [8, 32], strides = [1, 1]} : vector<8x128xf32> to vector<8x32xf32>
    %99 = vector.extract_strided_slice %94 {offsets = [0, 96], sizes = [8, 32], strides = [1, 1]} : vector<8x128xf32> to vector<8x32xf32>
    %100 = arith.mulf %97, %65 : vector<8x32xf32>
    %101 = arith.mulf %96, %98 : vector<8x32xf32>
    %102 = arith.addf %100, %101 : vector<8x32xf32>
    %103 = math.tanh %102 : vector<8x32xf32>
    %104 = arith.mulf %99, %103 : vector<8x32xf32>
    %105 = vector.extract_strided_slice %10 {offsets = [24, 0], sizes = [8, 128], strides = [1, 1]} : vector<64x128xf32> to vector<8x128xf32>
    %cst_21 = arith.constant dense<0.000000e+00> : vector<8x128xf32>
    %106 = tpu.matmul %85, %1, %cst_21 {dimension_numbers = #tpu.dot_dimension_numbers<[1], [0], [0], [1], [0, 0, 1, 1], [], []>} : vector<8x32xf32>, vector<32x128xf32>, vector<8x128xf32> -> vector<8x128xf32>
    %107 = arith.addf %105, %106 : vector<8x128xf32>
    %108 = arith.negf %107 : vector<8x128xf32>
    %109 = math.exp %108 : vector<8x128xf32>
    %cst_22 = arith.constant 1.000000e+00 : f32
    %110 = vector.broadcast %cst_22 : f32 to vector<8x128xf32>
    %111 = arith.addf %110, %109 : vector<8x128xf32>
    %112 = arith.divf %110, %111 : vector<8x128xf32>
    %113 = math.tanh %107 : vector<8x128xf32>
    %114 = vector.extract_strided_slice %112 {offsets = [0, 0], sizes = [8, 32], strides = [1, 1]} : vector<8x128xf32> to vector<8x32xf32>
    %115 = vector.extract_strided_slice %112 {offsets = [0, 32], sizes = [8, 32], strides = [1, 1]} : vector<8x128xf32> to vector<8x32xf32>
    %116 = vector.extract_strided_slice %113 {offsets = [0, 64], sizes = [8, 32], strides = [1, 1]} : vector<8x128xf32> to vector<8x32xf32>
    %117 = vector.extract_strided_slice %112 {offsets = [0, 96], sizes = [8, 32], strides = [1, 1]} : vector<8x128xf32> to vector<8x32xf32>
    %118 = arith.mulf %115, %83 : vector<8x32xf32>
    %119 = arith.mulf %114, %116 : vector<8x32xf32>
    %120 = arith.addf %118, %119 : vector<8x32xf32>
    %121 = math.tanh %120 : vector<8x32xf32>
    %122 = arith.mulf %117, %121 : vector<8x32xf32>
    %123 = tpu.concatenate %85, %104 in 1 : vector<8x32xf32>, vector<8x32xf32> -> vector<8x64xf32>
    %cst_23 = arith.constant dense<0.000000e+00> : vector<8x128xf32>
    %124 = tpu.matmul %123, %11, %cst_23 {dimension_numbers = #tpu.dot_dimension_numbers<[1], [0], [0], [1], [0, 0, 1, 1], [], []>} : vector<8x64xf32>, vector<64x128xf32>, vector<8x128xf32> -> vector<8x128xf32>
    %125 = vector.broadcast %12 : vector<1x128xf32> to vector<8x128xf32>
    %126 = arith.addf %124, %125 : vector<8x128xf32>
    %127 = arith.negf %126 : vector<8x128xf32>
    %128 = math.exp %127 : vector<8x128xf32>
    %cst_24 = arith.constant 1.000000e+00 : f32
    %129 = vector.broadcast %cst_24 : f32 to vector<8x128xf32>
    %130 = arith.addf %129, %128 : vector<8x128xf32>
    %131 = arith.divf %129, %130 : vector<8x128xf32>
    %132 = math.tanh %126 : vector<8x128xf32>
    %133 = vector.extract_strided_slice %131 {offsets = [0, 0], sizes = [8, 32], strides = [1, 1]} : vector<8x128xf32> to vector<8x32xf32>
    %134 = vector.extract_strided_slice %131 {offsets = [0, 32], sizes = [8, 32], strides = [1, 1]} : vector<8x128xf32> to vector<8x32xf32>
    %135 = vector.extract_strided_slice %132 {offsets = [0, 64], sizes = [8, 32], strides = [1, 1]} : vector<8x128xf32> to vector<8x32xf32>
    %136 = vector.extract_strided_slice %131 {offsets = [0, 96], sizes = [8, 32], strides = [1, 1]} : vector<8x128xf32> to vector<8x32xf32>
    %137 = arith.mulf %134, %102 : vector<8x32xf32>
    %138 = arith.mulf %133, %135 : vector<8x32xf32>
    %139 = arith.addf %137, %138 : vector<8x32xf32>
    %140 = math.tanh %139 : vector<8x32xf32>
    %141 = arith.mulf %136, %140 : vector<8x32xf32>
    %142 = vector.extract_strided_slice %10 {offsets = [32, 0], sizes = [8, 128], strides = [1, 1]} : vector<64x128xf32> to vector<8x128xf32>
    %cst_25 = arith.constant dense<0.000000e+00> : vector<8x128xf32>
    %143 = tpu.matmul %122, %1, %cst_25 {dimension_numbers = #tpu.dot_dimension_numbers<[1], [0], [0], [1], [0, 0, 1, 1], [], []>} : vector<8x32xf32>, vector<32x128xf32>, vector<8x128xf32> -> vector<8x128xf32>
    %144 = arith.addf %142, %143 : vector<8x128xf32>
    %145 = arith.negf %144 : vector<8x128xf32>
    %146 = math.exp %145 : vector<8x128xf32>
    %cst_26 = arith.constant 1.000000e+00 : f32
    %147 = vector.broadcast %cst_26 : f32 to vector<8x128xf32>
    %148 = arith.addf %147, %146 : vector<8x128xf32>
    %149 = arith.divf %147, %148 : vector<8x128xf32>
    %150 = math.tanh %144 : vector<8x128xf32>
    %151 = vector.extract_strided_slice %149 {offsets = [0, 0], sizes = [8, 32], strides = [1, 1]} : vector<8x128xf32> to vector<8x32xf32>
    %152 = vector.extract_strided_slice %149 {offsets = [0, 32], sizes = [8, 32], strides = [1, 1]} : vector<8x128xf32> to vector<8x32xf32>
    %153 = vector.extract_strided_slice %150 {offsets = [0, 64], sizes = [8, 32], strides = [1, 1]} : vector<8x128xf32> to vector<8x32xf32>
    %154 = vector.extract_strided_slice %149 {offsets = [0, 96], sizes = [8, 32], strides = [1, 1]} : vector<8x128xf32> to vector<8x32xf32>
    %155 = arith.mulf %152, %120 : vector<8x32xf32>
    %156 = arith.mulf %151, %153 : vector<8x32xf32>
    %157 = arith.addf %155, %156 : vector<8x32xf32>
    %158 = math.tanh %157 : vector<8x32xf32>
    %159 = arith.mulf %154, %158 : vector<8x32xf32>
    %160 = tpu.concatenate %122, %141 in 1 : vector<8x32xf32>, vector<8x32xf32> -> vector<8x64xf32>
    %cst_27 = arith.constant dense<0.000000e+00> : vector<8x128xf32>
    %161 = tpu.matmul %160, %11, %cst_27 {dimension_numbers = #tpu.dot_dimension_numbers<[1], [0], [0], [1], [0, 0, 1, 1], [], []>} : vector<8x64xf32>, vector<64x128xf32>, vector<8x128xf32> -> vector<8x128xf32>
    %162 = vector.broadcast %12 : vector<1x128xf32> to vector<8x128xf32>
    %163 = arith.addf %161, %162 : vector<8x128xf32>
    %164 = arith.negf %163 : vector<8x128xf32>
    %165 = math.exp %164 : vector<8x128xf32>
    %cst_28 = arith.constant 1.000000e+00 : f32
    %166 = vector.broadcast %cst_28 : f32 to vector<8x128xf32>
    %167 = arith.addf %166, %165 : vector<8x128xf32>
    %168 = arith.divf %166, %167 : vector<8x128xf32>
    %169 = math.tanh %163 : vector<8x128xf32>
    %170 = vector.extract_strided_slice %168 {offsets = [0, 0], sizes = [8, 32], strides = [1, 1]} : vector<8x128xf32> to vector<8x32xf32>
    %171 = vector.extract_strided_slice %168 {offsets = [0, 32], sizes = [8, 32], strides = [1, 1]} : vector<8x128xf32> to vector<8x32xf32>
    %172 = vector.extract_strided_slice %169 {offsets = [0, 64], sizes = [8, 32], strides = [1, 1]} : vector<8x128xf32> to vector<8x32xf32>
    %173 = vector.extract_strided_slice %168 {offsets = [0, 96], sizes = [8, 32], strides = [1, 1]} : vector<8x128xf32> to vector<8x32xf32>
    %174 = arith.mulf %171, %139 : vector<8x32xf32>
    %175 = arith.mulf %170, %172 : vector<8x32xf32>
    %176 = arith.addf %174, %175 : vector<8x32xf32>
    %177 = math.tanh %176 : vector<8x32xf32>
    %178 = arith.mulf %173, %177 : vector<8x32xf32>
    %179 = vector.extract_strided_slice %10 {offsets = [40, 0], sizes = [8, 128], strides = [1, 1]} : vector<64x128xf32> to vector<8x128xf32>
    %cst_29 = arith.constant dense<0.000000e+00> : vector<8x128xf32>
    %180 = tpu.matmul %159, %1, %cst_29 {dimension_numbers = #tpu.dot_dimension_numbers<[1], [0], [0], [1], [0, 0, 1, 1], [], []>} : vector<8x32xf32>, vector<32x128xf32>, vector<8x128xf32> -> vector<8x128xf32>
    %181 = arith.addf %179, %180 : vector<8x128xf32>
    %182 = arith.negf %181 : vector<8x128xf32>
    %183 = math.exp %182 : vector<8x128xf32>
    %cst_30 = arith.constant 1.000000e+00 : f32
    %184 = vector.broadcast %cst_30 : f32 to vector<8x128xf32>
    %185 = arith.addf %184, %183 : vector<8x128xf32>
    %186 = arith.divf %184, %185 : vector<8x128xf32>
    %187 = math.tanh %181 : vector<8x128xf32>
    %188 = vector.extract_strided_slice %186 {offsets = [0, 0], sizes = [8, 32], strides = [1, 1]} : vector<8x128xf32> to vector<8x32xf32>
    %189 = vector.extract_strided_slice %186 {offsets = [0, 32], sizes = [8, 32], strides = [1, 1]} : vector<8x128xf32> to vector<8x32xf32>
    %190 = vector.extract_strided_slice %187 {offsets = [0, 64], sizes = [8, 32], strides = [1, 1]} : vector<8x128xf32> to vector<8x32xf32>
    %191 = vector.extract_strided_slice %186 {offsets = [0, 96], sizes = [8, 32], strides = [1, 1]} : vector<8x128xf32> to vector<8x32xf32>
    %192 = arith.mulf %189, %157 : vector<8x32xf32>
    %193 = arith.mulf %188, %190 : vector<8x32xf32>
    %194 = arith.addf %192, %193 : vector<8x32xf32>
    %195 = math.tanh %194 : vector<8x32xf32>
    %196 = arith.mulf %191, %195 : vector<8x32xf32>
    %197 = tpu.concatenate %159, %178 in 1 : vector<8x32xf32>, vector<8x32xf32> -> vector<8x64xf32>
    %cst_31 = arith.constant dense<0.000000e+00> : vector<8x128xf32>
    %198 = tpu.matmul %197, %11, %cst_31 {dimension_numbers = #tpu.dot_dimension_numbers<[1], [0], [0], [1], [0, 0, 1, 1], [], []>} : vector<8x64xf32>, vector<64x128xf32>, vector<8x128xf32> -> vector<8x128xf32>
    %199 = vector.broadcast %12 : vector<1x128xf32> to vector<8x128xf32>
    %200 = arith.addf %198, %199 : vector<8x128xf32>
    %201 = arith.negf %200 : vector<8x128xf32>
    %202 = math.exp %201 : vector<8x128xf32>
    %cst_32 = arith.constant 1.000000e+00 : f32
    %203 = vector.broadcast %cst_32 : f32 to vector<8x128xf32>
    %204 = arith.addf %203, %202 : vector<8x128xf32>
    %205 = arith.divf %203, %204 : vector<8x128xf32>
    %206 = math.tanh %200 : vector<8x128xf32>
    %207 = vector.extract_strided_slice %205 {offsets = [0, 0], sizes = [8, 32], strides = [1, 1]} : vector<8x128xf32> to vector<8x32xf32>
    %208 = vector.extract_strided_slice %205 {offsets = [0, 32], sizes = [8, 32], strides = [1, 1]} : vector<8x128xf32> to vector<8x32xf32>
    %209 = vector.extract_strided_slice %206 {offsets = [0, 64], sizes = [8, 32], strides = [1, 1]} : vector<8x128xf32> to vector<8x32xf32>
    %210 = vector.extract_strided_slice %205 {offsets = [0, 96], sizes = [8, 32], strides = [1, 1]} : vector<8x128xf32> to vector<8x32xf32>
    %211 = arith.mulf %208, %176 : vector<8x32xf32>
    %212 = arith.mulf %207, %209 : vector<8x32xf32>
    %213 = arith.addf %211, %212 : vector<8x32xf32>
    %214 = math.tanh %213 : vector<8x32xf32>
    %215 = arith.mulf %210, %214 : vector<8x32xf32>
    %216 = vector.extract_strided_slice %10 {offsets = [48, 0], sizes = [8, 128], strides = [1, 1]} : vector<64x128xf32> to vector<8x128xf32>
    %cst_33 = arith.constant dense<0.000000e+00> : vector<8x128xf32>
    %217 = tpu.matmul %196, %1, %cst_33 {dimension_numbers = #tpu.dot_dimension_numbers<[1], [0], [0], [1], [0, 0, 1, 1], [], []>} : vector<8x32xf32>, vector<32x128xf32>, vector<8x128xf32> -> vector<8x128xf32>
    %218 = arith.addf %216, %217 : vector<8x128xf32>
    %219 = arith.negf %218 : vector<8x128xf32>
    %220 = math.exp %219 : vector<8x128xf32>
    %cst_34 = arith.constant 1.000000e+00 : f32
    %221 = vector.broadcast %cst_34 : f32 to vector<8x128xf32>
    %222 = arith.addf %221, %220 : vector<8x128xf32>
    %223 = arith.divf %221, %222 : vector<8x128xf32>
    %224 = math.tanh %218 : vector<8x128xf32>
    %225 = vector.extract_strided_slice %223 {offsets = [0, 0], sizes = [8, 32], strides = [1, 1]} : vector<8x128xf32> to vector<8x32xf32>
    %226 = vector.extract_strided_slice %223 {offsets = [0, 32], sizes = [8, 32], strides = [1, 1]} : vector<8x128xf32> to vector<8x32xf32>
    %227 = vector.extract_strided_slice %224 {offsets = [0, 64], sizes = [8, 32], strides = [1, 1]} : vector<8x128xf32> to vector<8x32xf32>
    %228 = vector.extract_strided_slice %223 {offsets = [0, 96], sizes = [8, 32], strides = [1, 1]} : vector<8x128xf32> to vector<8x32xf32>
    %229 = arith.mulf %226, %194 : vector<8x32xf32>
    %230 = arith.mulf %225, %227 : vector<8x32xf32>
    %231 = arith.addf %229, %230 : vector<8x32xf32>
    %232 = math.tanh %231 : vector<8x32xf32>
    %233 = arith.mulf %228, %232 : vector<8x32xf32>
    %234 = tpu.concatenate %196, %215 in 1 : vector<8x32xf32>, vector<8x32xf32> -> vector<8x64xf32>
    %cst_35 = arith.constant dense<0.000000e+00> : vector<8x128xf32>
    %235 = tpu.matmul %234, %11, %cst_35 {dimension_numbers = #tpu.dot_dimension_numbers<[1], [0], [0], [1], [0, 0, 1, 1], [], []>} : vector<8x64xf32>, vector<64x128xf32>, vector<8x128xf32> -> vector<8x128xf32>
    %236 = vector.broadcast %12 : vector<1x128xf32> to vector<8x128xf32>
    %237 = arith.addf %235, %236 : vector<8x128xf32>
    %238 = arith.negf %237 : vector<8x128xf32>
    %239 = math.exp %238 : vector<8x128xf32>
    %cst_36 = arith.constant 1.000000e+00 : f32
    %240 = vector.broadcast %cst_36 : f32 to vector<8x128xf32>
    %241 = arith.addf %240, %239 : vector<8x128xf32>
    %242 = arith.divf %240, %241 : vector<8x128xf32>
    %243 = math.tanh %237 : vector<8x128xf32>
    %244 = vector.extract_strided_slice %242 {offsets = [0, 0], sizes = [8, 32], strides = [1, 1]} : vector<8x128xf32> to vector<8x32xf32>
    %245 = vector.extract_strided_slice %242 {offsets = [0, 32], sizes = [8, 32], strides = [1, 1]} : vector<8x128xf32> to vector<8x32xf32>
    %246 = vector.extract_strided_slice %243 {offsets = [0, 64], sizes = [8, 32], strides = [1, 1]} : vector<8x128xf32> to vector<8x32xf32>
    %247 = vector.extract_strided_slice %242 {offsets = [0, 96], sizes = [8, 32], strides = [1, 1]} : vector<8x128xf32> to vector<8x32xf32>
    %248 = arith.mulf %245, %213 : vector<8x32xf32>
    %249 = arith.mulf %244, %246 : vector<8x32xf32>
    %250 = arith.addf %248, %249 : vector<8x32xf32>
    %251 = math.tanh %250 : vector<8x32xf32>
    %252 = arith.mulf %247, %251 : vector<8x32xf32>
    %253 = vector.extract_strided_slice %10 {offsets = [56, 0], sizes = [8, 128], strides = [1, 1]} : vector<64x128xf32> to vector<8x128xf32>
    %cst_37 = arith.constant dense<0.000000e+00> : vector<8x128xf32>
    %254 = tpu.matmul %233, %1, %cst_37 {dimension_numbers = #tpu.dot_dimension_numbers<[1], [0], [0], [1], [0, 0, 1, 1], [], []>} : vector<8x32xf32>, vector<32x128xf32>, vector<8x128xf32> -> vector<8x128xf32>
    %255 = arith.addf %253, %254 : vector<8x128xf32>
    %256 = arith.negf %255 : vector<8x128xf32>
    %257 = math.exp %256 : vector<8x128xf32>
    %cst_38 = arith.constant 1.000000e+00 : f32
    %258 = vector.broadcast %cst_38 : f32 to vector<8x128xf32>
    %259 = arith.addf %258, %257 : vector<8x128xf32>
    %260 = arith.divf %258, %259 : vector<8x128xf32>
    %261 = math.tanh %255 : vector<8x128xf32>
    %262 = vector.extract_strided_slice %260 {offsets = [0, 0], sizes = [8, 32], strides = [1, 1]} : vector<8x128xf32> to vector<8x32xf32>
    %263 = vector.extract_strided_slice %260 {offsets = [0, 32], sizes = [8, 32], strides = [1, 1]} : vector<8x128xf32> to vector<8x32xf32>
    %264 = vector.extract_strided_slice %261 {offsets = [0, 64], sizes = [8, 32], strides = [1, 1]} : vector<8x128xf32> to vector<8x32xf32>
    %265 = vector.extract_strided_slice %260 {offsets = [0, 96], sizes = [8, 32], strides = [1, 1]} : vector<8x128xf32> to vector<8x32xf32>
    %266 = arith.mulf %263, %231 : vector<8x32xf32>
    %267 = arith.mulf %262, %264 : vector<8x32xf32>
    %268 = arith.addf %266, %267 : vector<8x32xf32>
    %269 = math.tanh %268 : vector<8x32xf32>
    %270 = arith.mulf %265, %269 : vector<8x32xf32>
    %271 = tpu.concatenate %233, %252 in 1 : vector<8x32xf32>, vector<8x32xf32> -> vector<8x64xf32>
    %cst_39 = arith.constant dense<0.000000e+00> : vector<8x128xf32>
    %272 = tpu.matmul %271, %11, %cst_39 {dimension_numbers = #tpu.dot_dimension_numbers<[1], [0], [0], [1], [0, 0, 1, 1], [], []>} : vector<8x64xf32>, vector<64x128xf32>, vector<8x128xf32> -> vector<8x128xf32>
    %273 = vector.broadcast %12 : vector<1x128xf32> to vector<8x128xf32>
    %274 = arith.addf %272, %273 : vector<8x128xf32>
    %275 = arith.negf %274 : vector<8x128xf32>
    %276 = math.exp %275 : vector<8x128xf32>
    %cst_40 = arith.constant 1.000000e+00 : f32
    %277 = vector.broadcast %cst_40 : f32 to vector<8x128xf32>
    %278 = arith.addf %277, %276 : vector<8x128xf32>
    %279 = arith.divf %277, %278 : vector<8x128xf32>
    %280 = math.tanh %274 : vector<8x128xf32>
    %281 = vector.extract_strided_slice %279 {offsets = [0, 0], sizes = [8, 32], strides = [1, 1]} : vector<8x128xf32> to vector<8x32xf32>
    %282 = vector.extract_strided_slice %279 {offsets = [0, 32], sizes = [8, 32], strides = [1, 1]} : vector<8x128xf32> to vector<8x32xf32>
    %283 = vector.extract_strided_slice %280 {offsets = [0, 64], sizes = [8, 32], strides = [1, 1]} : vector<8x128xf32> to vector<8x32xf32>
    %284 = vector.extract_strided_slice %279 {offsets = [0, 96], sizes = [8, 32], strides = [1, 1]} : vector<8x128xf32> to vector<8x32xf32>
    %285 = arith.mulf %282, %250 : vector<8x32xf32>
    %286 = arith.mulf %281, %283 : vector<8x32xf32>
    %287 = arith.addf %285, %286 : vector<8x32xf32>
    %288 = math.tanh %287 : vector<8x32xf32>
    %289 = arith.mulf %284, %288 : vector<8x32xf32>
    %290 = tpu.concatenate %270, %289 in 1 : vector<8x32xf32>, vector<8x32xf32> -> vector<8x64xf32>
    %cst_41 = arith.constant dense<0.000000e+00> : vector<8x128xf32>
    %291 = tpu.matmul %290, %11, %cst_41 {dimension_numbers = #tpu.dot_dimension_numbers<[1], [0], [0], [1], [0, 0, 1, 1], [], []>} : vector<8x64xf32>, vector<64x128xf32>, vector<8x128xf32> -> vector<8x128xf32>
    %292 = vector.broadcast %12 : vector<1x128xf32> to vector<8x128xf32>
    %293 = arith.addf %291, %292 : vector<8x128xf32>
    %294 = arith.negf %293 : vector<8x128xf32>
    %295 = math.exp %294 : vector<8x128xf32>
    %cst_42 = arith.constant 1.000000e+00 : f32
    %296 = vector.broadcast %cst_42 : f32 to vector<8x128xf32>
    %297 = arith.addf %296, %295 : vector<8x128xf32>
    %298 = arith.divf %296, %297 : vector<8x128xf32>
    %299 = math.tanh %293 : vector<8x128xf32>
    %300 = vector.extract_strided_slice %298 {offsets = [0, 0], sizes = [8, 32], strides = [1, 1]} : vector<8x128xf32> to vector<8x32xf32>
    %301 = vector.extract_strided_slice %298 {offsets = [0, 32], sizes = [8, 32], strides = [1, 1]} : vector<8x128xf32> to vector<8x32xf32>
    %302 = vector.extract_strided_slice %299 {offsets = [0, 64], sizes = [8, 32], strides = [1, 1]} : vector<8x128xf32> to vector<8x32xf32>
    %303 = vector.extract_strided_slice %298 {offsets = [0, 96], sizes = [8, 32], strides = [1, 1]} : vector<8x128xf32> to vector<8x32xf32>
    %304 = arith.mulf %301, %287 : vector<8x32xf32>
    %305 = arith.mulf %300, %302 : vector<8x32xf32>
    %306 = arith.addf %304, %305 : vector<8x32xf32>
    %307 = math.tanh %306 : vector<8x32xf32>
    %308 = arith.mulf %303, %307 : vector<8x32xf32>
    %c96 = arith.constant 96 : index
    %c0_43 = arith.constant 0 : index
    %309 = vector.load %arg1[%c96, %c0_43] : memref<104x32xf32, #tpu.memory_space<vmem>>, vector<8x1xf32>
    %c170 = arith.constant 170 : index
    %c0_44 = arith.constant 0 : index
    %310 = vector.load %arg0[%c170, %c0_44] : memref<176x128xf32, #tpu.memory_space<vmem>>, vector<1x32xf32>
    %c171 = arith.constant 171 : index
    %c0_45 = arith.constant 0 : index
    %311 = vector.load %arg0[%c171, %c0_45] : memref<176x128xf32, #tpu.memory_space<vmem>>, vector<1x32xf32>
    %312 = vector.broadcast %309 : vector<8x1xf32> to vector<8x32xf32>
    %313 = vector.broadcast %310 : vector<1x32xf32> to vector<8x32xf32>
    %314 = arith.mulf %312, %313 : vector<8x32xf32>
    %315 = vector.broadcast %311 : vector<1x32xf32> to vector<8x32xf32>
    %316 = arith.addf %314, %315 : vector<8x32xf32>
    %cst_46 = arith.constant 0.000000e+00 : f32
    %317 = vector.broadcast %cst_46 : f32 to vector<8x32xf32>
    %318 = arith.maximumf %316, %317 : vector<8x32xf32>
    %cst_47 = arith.constant 0.000000e+00 : f32
    %319 = vector.broadcast %cst_47 : f32 to vector<8x32xf32>
    %320 = arith.maximumf %308, %319 : vector<8x32xf32>
    %321 = tpu.concatenate %318, %320 in 1 : vector<8x32xf32>, vector<8x32xf32> -> vector<8x64xf32>
    %c96_48 = arith.constant 96 : index
    %c0_49 = arith.constant 0 : index
    %322 = vector.load %arg0[%c96_48, %c0_49] : memref<176x128xf32, #tpu.memory_space<vmem>>, vector<64x4xf32>
    %c172 = arith.constant 172 : index
    %c0_50 = arith.constant 0 : index
    %323 = vector.load %arg0[%c172, %c0_50] : memref<176x128xf32, #tpu.memory_space<vmem>>, vector<1x4xf32>
    %cst_51 = arith.constant dense<0.000000e+00> : vector<8x4xf32>
    %324 = tpu.matmul %321, %322, %cst_51 {dimension_numbers = #tpu.dot_dimension_numbers<[1], [0], [0], [1], [0, 0, 1, 1], [], []>} : vector<8x64xf32>, vector<64x4xf32>, vector<8x4xf32> -> vector<8x4xf32>
    %325 = vector.broadcast %323 : vector<1x4xf32> to vector<8x4xf32>
    %326 = arith.addf %324, %325 : vector<8x4xf32>
    %327 = math.tanh %326 : vector<8x4xf32>
    %c0_52 = arith.constant 0 : index
    %c0_53 = arith.constant 0 : index
    %328 = vector.load %arg2[%c0_52, %c0_53] : memref<8x4xf32, #tpu.memory_space<vmem>>, vector<8x4xf32>
    tpu.vector_store %arg2[%c0_52, %c0_53], %327 {strides = array<i32>} : memref<8x4xf32, #tpu.memory_space<vmem>>, vector<8x4xf32>,
    return
  }
}

</mosaic_0001>

<bundles_post_ra>
// kernel: actor_forward.1
= control target key start
LH: loop header
LB: loop body
LE: loop exit
PB: predicated region body
PF: predicated region fallthrough
CT: control target
= control target key end

     0   :  { %vm58_vm0 = vcmask 1045504   ;;  %vm33_vm1 = vcmask 48128   ;;  %v2676_v0 = vmov 0.0|0.0   ;;  %vm2677_vm2 = vmmov 0   ;;  %s2679_s27 = smov 64   ;;  %s2680_s30 = smov 32   ;;  %s3151_s0 = inlined_call_operand.vmem [shape: f32[176,128], index: 0, kind: input, shape index: {}]   ;;  %s3152_s1 = inlined_call_operand.vmem [shape: f32[104,32], index: 1, kind: input, shape index: {}]   ;;  %s3153_s2 = inlined_call_operand.vmem [shape: f32[8,4], index: 2, kind: output, shape index: {}]  }
   0x1   :  { %2383 = vmatprep.subr.bf16.mxu1 %v2676_v0  ;;  %v12_v1 = vld [vmem:[%s3151_s0] sm:$0xff]  ;;  %v13_v2 = vld [vmem:[%s3151_s0 + $0x8] sm:$0xff]  ;;  %v14_v7 = vld [vmem:[%s3151_s0 + $0x10] sm:$0xff]  ;;  %v2678_v8 = vmov 0.0   ;;  %vm176_vm3 = vcmask 261120   ;;  %vm389_vm4 = vcmask 523264  }
   0x2   :  { %v11_v3 = vld [vmem:[%s3151_s0 + $0xa0] sm:$0x3f]  ;;  %v2707_v4 = vpack.c.bf16 %v13_v2, %v12_v1  ;;  %v18_v6 = vld [vmem:[%s3152_s1 + $0x8] sm:$0xff]  ;;  %2132 = vmatprep.mubr.msk.f32.mxu1 %vm2677_vm2, %v2678_v8  ;;  %v15_v9 = vld [vmem:[%s3151_s0 + $0x18] sm:$0xff]  ;;  %vm1927_vm5 = vcmask 31744  }
   0x3   :  { %2110 = vmatprep.subr.msk.mxu0 %vm58_vm0, %v11_v3  ;;  %v17_v5 = vld [vmem:[%s3152_s1] sm:$0xff]  ;;  %v2728_v10 = vpack.c.bf16 %v15_v9, %v14_v7  ;;  %v2749_v13 = vld [vmem:[%s3151_s0 + $0xa8] ss:$0 sm:$0xff]  ;;  %v27_v20 = vld [vmem:[%s3152_s1 + $0x50] sm:$0xff] }
   0x4   :  { %2111 = vmatpush3.msk.msra.mxu0 %vm58_vm0, %v11_v3  ;;  %2112 = vmatprep.mubr.msk.f32.mxu0 %vm33_vm1, %v17_v5  ;;  %v25_v11 = vld [vmem:[%s3152_s1 + $0x40] sm:$0xff]  ;;  %v168_v32 = vld [vmem:[%s3151_s0 + $0x28] sm:$0xff]  ;;  %v19_v33 = vld [vmem:[%s3152_s1 + $0x10] sm:$0xff] }
   0x5   :  { %2385 = vmatpush3.bf16.msra.mxu1 %v2707_v4  ;;  %2113 = vmatmul.mubr.msk.f32.vlgmr.msra.gmra.mrb[0].mxu0 %vm33_vm1, %v18_v6  ;;  %v167_v31 = vld [vmem:[%s3151_s0 + $0x20] sm:$0xff]  ;;  %v20_v35 = vld [vmem:[%s3152_s1 + $0x18] sm:$0xff]  ;;  %v169_v36 = vld [vmem:[%s3151_s0 + $0x30] sm:$0xff] }
   0x6   :  { %2386 = vmatprep.subr.bf16.mxu1 %v2676_v0  ;;  %2395 = vmatprep.subr.bf16.mxu0 %v2676_v0  ;;  %v2770_v34 = vpack.c.bf16 %v168_v32, %v167_v31  ;;  %v170_v37 = vld [vmem:[%s3151_s0 + $0x38] sm:$0xff]  ;;  %v21_v38 = vld [vmem:[%s3152_s1 + $0x20] sm:$0xff]  ;;  %v22_v40 = vld [vmem:[%s3152_s1 + $0x28] sm:$0xff] }
   0x7   :  { %2115 = vmatprep.mubr.msk.f32.mxu0 %vm33_vm1, %v19_v33  ;;  %v2787_v39 = vpack.c.bf16 %v170_v37, %v169_v36  ;;  %v171_v41 = vld [vmem:[%s3151_s0 + $0x40] sm:$0xff]  ;;  %v172_v42 = vld [vmem:[%s3151_s0 + $0x48] sm:$0xff]  ;;  %v23_v43 = vld [vmem:[%s3152_s1 + $0x30] sm:$0xff] }
   0x8   :  { %2397 = vmatpush3.bf16.msra.mxu0 %v2770_v34  ;;  %v2805_v44 = vpack.c.bf16 %v172_v42, %v171_v41  ;;  %v24_v45 = vld [vmem:[%s3152_s1 + $0x38] sm:$0xff]  ;;  %v173_v46 = vld [vmem:[%s3151_s0 + $0x50] sm:$0xff]  ;;  %v26_v50 = vld [vmem:[%s3152_s1 + $0x48] sm:$0xff] }
   0x9   :  { %2388 = vmatpush3.bf16.msra.mxu1 %v2728_v10  ;;  %2116 = vmatmul.mubr.msk.f32.gmra.mrb[2].mxu0 %vm33_vm1, %v20_v35  ;;  %v174_v47 = vld [vmem:[%s3151_s0 + $0x58] sm:$0xff]  ;;  %v2865_v63 = vld [vmem:[%s3151_s0 + $0xa9] ss:$0 sm:$0xff] }
   0xa   :  { %2389 = vmatprep.subr.bf16.mxu1 %v2676_v0  ;;  %2118 = vmatprep.mubr.msk.f32.mxu0 %vm33_vm1, %v21_v38  ;;  %v2821_v49 = vpack.c.bf16 %v174_v47, %v173_v46 }
   0xb   :  { %2398 = vmatprep.subr.bf16.mxu0 %v2676_v0 }
   0xc   :  { %2133 = vmatmul.mubr.msk.f32.vlgmr.msra.gmra.mrb[0].mxu1 %vm176_vm3, %v25_v11  ;;  %2400 = vmatpush3.bf16.msra.mxu0 %v2787_v39 }
   0xd   :  { %2391 = vmatpush3.bf16.msra.mxu1 %v2707_v4  ;;  %2143 = vmatprep.mubr.msk.f32.mxu1 %vm2677_vm2, %v2678_v8 }
   0xe   :  { %2392 = vmatprep.subr.bf16.mxu1 %v2676_v0  ;;  %2119 = vmatmul.mubr.msk.f32.gmra.mrb[4].mxu0 %vm33_vm1, %v22_v40 }
   0xf   :  { %2121 = vmatprep.mubr.msk.f32.mxu0 %vm33_vm1, %v23_v43  ;;  %2401 = vmatprep.subr.bf16.mxu0 %v2676_v0 }
  0x10   :  { %2403 = vmatpush3.bf16.msra.mxu0 %v2805_v44 }
  0x11   :  { %2394 = vmatpush3.bf16.msra.mxu1 %v2728_v10  ;;  %2404 = vmatprep.subr.bf16.mxu0 %v2676_v0 }
  0x12   :  { %2425 = vmatprep.subr.bf16.mxu1 %v2676_v0  ;;  %2122 = vmatmul.mubr.msk.f32.gmra.mrb[6].mxu0 %vm33_vm1, %v24_v45 }
  0x13   :  { %2162 = vmatprep.mubr.msk.f32.mxu0 %vm2677_vm2, %v2678_v8 }
  0x14   :  { %2406 = vmatpush3.bf16.msra.mxu0 %v2821_v49 }
  0x15   :  { %2407 = vmatprep.subr.bf16.mxu0 %v2676_v0 }
  0xd8   :  { %v2744_v12 = vpop.f32.mrb[0].mxu0 }
  0xd9   :  { %v128_v14 = vpop.f32.mrb[1].mxu0  ;;  %v134_v62 = vadd.f32 %v2744_v12, %v2749_v13  ;;  %v28_v12 = vld [vmem:[%s3152_s1 + $0x58] sm:$0xff] }
  0xda   :  { %v129_v15 = vadd.f32 %v2749_v13, %v128_v14 }
  0xdc   :  { %v2833_v53 = vpop.f32.mrb[2].mxu0 }
  0xdd   :  { %v2835_v54 = vpop.f32.mrb[3].mxu0 }
  0xde   :  { %v139_v45 = vadd.f32 %v2749_v13, %v2835_v54 }
  0xdf   :  { %v246_v16 = vpop.f32.mrb[0].mxu1 }
  0xe0   :  { %v250_v17 = vadd.f32 %v246_v16, %v129_v15  ;;  %v2134_v18 = vpop.f32.mrb[1].mxu1 }
  0xe1   :  { %v2837_v55 = vpop.f32.mrb[4].mxu0 }
  0xe2   :  { %2546 = vtanh.f32 %v250_v17  ;;  %v1944_v21 = vmul.f32 -1.442695, %v250_v17  ;;  %v2839_v56 = vpop.f32.mrb[5].mxu0 }
  0xe4   :  { %2548 = vpow2.f32 %v1944_v21 }
  0xe5   :  { %v2841_v57 = vpop.f32.mrb[6].mxu0 }
  0xe6   :  { %v2843_v58 = vpop.f32.mrb[7].mxu0 }
  0xec   :  { %v2547_v19 = vpop.eup %2546 }
  0xed   :  { %264 = vrot.lane.b32.xlu0 %v2547_v19, %s2679_s27 }
  0xee   :  { %v2549_v22 = vpop.eup %2548 }
  0xef   :  { %v254_v23 = vadd.f32 1.0, %v2549_v22 }
  0xf1   :  { %259 = vrot.lane.b32.xlu0 %v27_v20, %s2680_s30  ;;  %2550 = vrcp.f32 %v254_v23 }
  0xfb   :  { %v2551_v24 = vpop.eup %2550 }
 0x15f   :  { %v265_v25 = vpop.permute.xlu0 %264 }
 0x160   :  { %v267_v26 = vmul.f32 %v2551_v24, %v265_v25 }
 0x162   :  { %269 = vrot.lane.b32.xlu1 %v267_v26, %s2680_s30 }
 0x163   :  { %v260_v27 = vpop.permute.xlu0 %259 }
 0x164   :  { %v262_v28 = vmul.f32 %v2551_v24, %v260_v27 }
 0x1d4   :  { %v270_v29 = vpop.permute.xlu1 %269 }
 0x1d5   :  { %v2758_v30 = vadd.f32 %v270_v29, %v262_v28 }
 0x1d7   :  { %2552 = vtanh.f32 %v2758_v30 }
 0x1e1   :  { %v2553_v48 = vpop.eup %2552 }
 0x1e2   :  { %275 = vrot.lane.b32.xlu1 %v2553_v48, %s2679_s27 }
 0x1e6   :  { %381 = vrot.lane.b32.xlu1 %v26_v50, %s2680_s30 }
 0x254   :  { %v276_v51 = vpop.permute.xlu1 %275 }
 0x255   :  { %v278_v52 = vmul.f32 %v2551_v24, %v276_v51 }
 0x257   :  { %280 = vrot.lane.b32.xlu0 %v278_v52, %s2680_s30 }
 0x258   :  { %v382_v59 = vpop.permute.xlu1 %381 }
 0x2c9   :  { %v281_v60 = vpop.permute.xlu0 %280 }
 0x2ca   :  { %v384_v61 = vsel %vm176_vm3, %v281_v60, %v382_v59  ;;  %2144 = vmatmul.mubr.msk.f32.vlgmr.msra.gmra.mrb[2].mxu1 %vm176_vm3, %v281_v60 }
 0x2cb   :  { %2163 = vmatmul.mubr.msk.f32.vlgmr.msra.gmra.mrb[8].mxu0 %vm389_vm4, %v384_v61  ;;  %2427 = vmatpush3.bf16.msra.mxu1 %v2707_v4 }
 0x2cc   :  { %2409 = vmatpush3.bf16.msra.mxu0 %v2707_v4  ;;  %2173 = vmatprep.mubr.msk.f32.mxu0 %vm2677_vm2, %v2678_v8 }
 0x2cd   :  { %2410 = vmatprep.subr.bf16.mxu0 %v2676_v0  ;;  %2428 = vmatprep.subr.bf16.mxu1 %v2676_v0 }
 0x2ce   :  { %2203 = vmatprep.mubr.msk.f32.mxu1 %vm2677_vm2, %v2678_v8 }
 0x2cf   :  { %2430 = vmatpush3.bf16.msra.mxu1 %v2728_v10 }
 0x2d0   :  { %2412 = vmatpush3.bf16.msra.mxu0 %v2728_v10  ;;  %2431 = vmatprep.subr.bf16.mxu1 %v2676_v0 }
 0x2d1   :  { %2413 = vmatprep.subr.bf16.mxu0 %v2676_v0 }
 0x39d   :  { %v350_v1 = vpop.f32.mrb[2].mxu1 }
 0x39e   :  { %v354_v2 = vadd.f32 %v350_v1, %v134_v62  ;;  %v2145_v3 = vpop.f32.mrb[3].mxu1  ;;  %v459_v5 = vpop.f32.mrb[8].mxu0 }
 0x39f   :  { %v460_v6 = vadd.f32 %v2865_v63, %v459_v5  ;;  %v2164_v7 = vpop.f32.mrb[9].mxu0 }
 0x3a0   :  { %2554 = vtanh.f32 %v354_v2  ;;  %v1946_v14 = vmul.f32 -1.442695, %v354_v2 }
 0x3a1   :  { %2556 = vtanh.f32 %v460_v6  ;;  %v1949_v15 = vmul.f32 -1.442695, %v460_v6 }
 0x3a2   :  { %2558 = vpow2.f32 %v1946_v14 }
 0x3a3   :  { %2560 = vpow2.f32 %v1949_v15 }
 0x3aa   :  { %v2555_v9 = vpop.eup %2554 }
 0x3ab   :  { %v2557_v11 = vpop.eup %2556  ;;  %364 = vrot.lane.b32.xlu0 %v2555_v9, %s2679_s27 }
 0x3ac   :  { %476 = vrot.lane.b32.xlu1 %v2557_v11, %s2679_s27  ;;  %v2559_v16 = vpop.eup %2558 }
 0x3ad   :  { %v358_v17 = vadd.f32 1.0, %v2559_v16  ;;  %v2561_v18 = vpop.eup %2560 }
 0x3ae   :  { %v466_v19 = vadd.f32 1.0, %v2561_v18 }
 0x3af   :  { %2562 = vrcp.f32 %v358_v17 }
 0x3b0   :  { %471 = vrot.lane.b32.xlu1 %v28_v12, %s2680_s30  ;;  %2564 = vrcp.f32 %v466_v19 }
 0x3b9   :  { %v2563_v20 = vpop.eup %2562 }
 0x3ba   :  { %v2565_v24 = vpop.eup %2564  ;;  %v362_v26 = vmul.f32 %v2563_v20, %v2758_v30 }
 0x41d   :  { %v365_v21 = vpop.permute.xlu0 %364 }
 0x41e   :  { %v367_v22 = vmul.f32 %v2563_v20, %v365_v21  ;;  %v477_v23 = vpop.permute.xlu1 %476 }
 0x41f   :  { %v479_v25 = vmul.f32 %v2565_v24, %v477_v23 }
 0x420   :  { %369 = vrot.lane.b32.xlu0 %v367_v22, %s2680_s30 }
 0x422   :  { %v472_v27 = vpop.permute.xlu1 %471 }
 0x423   :  { %v474_v31 = vmul.f32 %v2565_v24, %v472_v27 }
 0x424   :  { %481 = vrot.lane.b32.xlu0 %v479_v25, %s2680_s30 }
 0x492   :  { %v370_v28 = vpop.permute.xlu0 %369 }
 0x493   :  { %v2877_v29 = vadd.f32 %v370_v28, %v362_v26 }
 0x495   :  { %2566 = vtanh.f32 %v2877_v29 }
 0x496   :  { %v482_v32 = vpop.permute.xlu0 %481 }
 0x497   :  { %v2880_v33 = vadd.f32 %v482_v32, %v474_v31 }
 0x499   :  { %2568 = vtanh.f32 %v2880_v33 }
 0x49f   :  { %v2567_v35 = vpop.eup %2566 }
 0x4a0   :  { %375 = vrot.lane.b32.xlu1 %v2567_v35, %s2679_s27 }
 0x4a3   :  { %v2569_v36 = vpop.eup %2568 }
 0x4a4   :  { %487 = vrot.lane.b32.xlu0 %v2569_v36, %s2679_s27 }
 0x512   :  { %v376_v37 = vpop.permute.xlu1 %375 }
 0x513   :  { %v378_v30 = vmul.f32 %v2563_v20, %v376_v37 }
 0x515   :  { %492 = vrot.lane.b32.xlu1 %v378_v30, %s2680_s30 }
 0x516   :  { %v488_v38 = vpop.permute.xlu0 %487 }
 0x517   :  { %v490_v40 = vmul.f32 %v2565_v24, %v488_v38 }
 0x519   :  { %593 = vrot.lane.b32.xlu0 %v490_v40, %s2679_s27 }
 0x587   :  { %v493_v41 = vpop.permute.xlu1 %492 }
 0x588   :  { %2174 = vmatmul.mubr.msk.f32.vlgmr.msra.gmra.mrb[10].mxu0 %vm176_vm3, %v493_v41 }
 0x589   :  { %2415 = vmatpush3.bf16.msra.mxu0 %v2770_v34  ;;  %2192 = vmatprep.mubr.msk.f32.mxu0 %vm2677_vm2, %v2678_v8 }
 0x58a   :  { %2416 = vmatprep.subr.bf16.mxu0 %v2676_v0 }
 0x58b   :  { %v594_v42 = vpop.permute.xlu0 %593 }
 0x58c   :  { %v596_v43 = vsel %vm176_vm3, %v493_v41, %v594_v42 }
 0x58d   :  { %2418 = vmatpush3.bf16.msra.mxu0 %v2787_v39 }
 0x58e   :  { %2419 = vmatprep.subr.bf16.mxu0 %v2676_v0 }
 0x591   :  { %2421 = vmatpush3.bf16.msra.mxu0 %v2805_v44 }
 0x592   :  { %2422 = vmatprep.subr.bf16.mxu0 %v2676_v0 }
 0x595   :  { %2424 = vmatpush3.bf16.msra.mxu0 %v2821_v49 }
 0x596   :  { %2443 = vmatprep.subr.bf16.mxu0 %v2676_v0 }
 0x598   :  { %2193 = vmatmul.mubr.msk.f32.vlgmr.msra.gmra.mrb[12].mxu0 %vm389_vm4, %v596_v43 }
 0x599   :  { %2445 = vmatpush3.bf16.msra.mxu0 %v2707_v4  ;;  %2233 = vmatprep.mubr.msk.f32.mxu0 %vm2677_vm2, %v2678_v8 }
 0x59a   :  { %2446 = vmatprep.subr.bf16.mxu0 %v2676_v0 }
 0x59d   :  { %2448 = vmatpush3.bf16.msra.mxu0 %v2728_v10 }
 0x59e   :  { %2449 = vmatprep.subr.bf16.mxu0 %v2676_v0 }
 0x65b   :  { %v562_v46 = vpop.f32.mrb[10].mxu0 }
 0x65c   :  { %v566_v47 = vadd.f32 %v562_v46, %v139_v45  ;;  %v2175_v48 = vpop.f32.mrb[11].mxu0 }
 0x65e   :  { %2570 = vtanh.f32 %v566_v47  ;;  %v1951_v61 = vmul.f32 -1.442695, %v566_v47 }
 0x668   :  { %v2571_v50 = vpop.eup %2570 }
 0x669   :  { %576 = vrot.lane.b32.xlu1 %v2571_v50, %s2679_s27 }
 0x66b   :  { %v666_v51 = vpop.f32.mrb[12].mxu0 }
 0x66c   :  { %v667_v52 = vadd.f32 %v2865_v63, %v666_v51  ;;  %v2194_v59 = vpop.f32.mrb[13].mxu0 }
 0x66e   :  { %2572 = vtanh.f32 %v667_v52  ;;  %v1953_v1 = vmul.f32 -1.442695, %v667_v52 }
 0x66f   :  { %2574 = vpow2.f32 %v1951_v61 }
 0x670   :  { %2576 = vpow2.f32 %v1953_v1 }
 0x678   :  { %v2573_v60 = vpop.eup %2572 }
 0x679   :  { %679 = vrot.lane.b32.xlu0 %v2573_v60, %s2679_s27  ;;  %v2575_v62 = vpop.eup %2574 }
 0x67a   :  { %v570_v54 = vadd.f32 1.0, %v2575_v62  ;;  %v2577_v2 = vpop.eup %2576 }
 0x67b   :  { %v673_v7 = vadd.f32 1.0, %v2577_v2 }
 0x67c   :  { %2578 = vrcp.f32 %v570_v54 }
 0x67d   :  { %2580 = vrcp.f32 %v673_v7 }
 0x686   :  { %v2579_v3 = vpop.eup %2578 }
 0x687   :  { %v2581_v9 = vpop.eup %2580  ;;  %v574_v14 = vmul.f32 %v2579_v3, %v2877_v29  ;;  %v144_v29 = vadd.f32 %v2833_v53, %v2749_v13 }
 0x688   :  { %v677_v18 = vmul.f32 %v2581_v9, %v2880_v33 }
 0x6db   :  { %v577_v5 = vpop.permute.xlu1 %576 }
 0x6dc   :  { %v579_v6 = vmul.f32 %v2579_v3, %v577_v5 }
 0x6de   :  { %581 = vrot.lane.b32.xlu1 %v579_v6, %s2680_s30 }
 0x6eb   :  { %v680_v11 = vpop.permute.xlu0 %679 }
 0x6ec   :  { %v682_v12 = vmul.f32 %v2581_v9, %v680_v11 }
 0x6ee   :  { %684 = vrot.lane.b32.xlu0 %v682_v12, %s2680_s30 }
 0x750   :  { %v582_v15 = vpop.permute.xlu1 %581 }
 0x751   :  { %v2914_v16 = vadd.f32 %v582_v15, %v574_v14  ;;  %v149_v15 = vadd.f32 %v2749_v13, %v2839_v56 }
 0x753   :  { %2582 = vtanh.f32 %v2914_v16 }
 0x75d   :  { %v2583_v17 = vpop.eup %2582 }
 0x75e   :  { %587 = vrot.lane.b32.xlu1 %v2583_v17, %s2679_s27 }
 0x760   :  { %v685_v19 = vpop.permute.xlu0 %684 }
 0x761   :  { %v2919_v20 = vadd.f32 %v685_v19, %v677_v18 }
 0x763   :  { %2584 = vtanh.f32 %v2919_v20 }
 0x76d   :  { %v2585_v21 = vpop.eup %2584 }
 0x76e   :  { %690 = vrot.lane.b32.xlu0 %v2585_v21, %s2679_s27 }
 0x7d0   :  { %v588_v22 = vpop.permute.xlu1 %587 }
 0x7d1   :  { %v590_v23 = vmul.f32 %v2579_v3, %v588_v22 }
 0x7d3   :  { %695 = vrot.lane.b32.xlu1 %v590_v23, %s2680_s30 }
 0x7e0   :  { %v691_v24 = vpop.permute.xlu0 %690 }
 0x7e1   :  { %v693_v25 = vmul.f32 %v2581_v9, %v691_v24 }
 0x7e3   :  { %796 = vrot.lane.b32.xlu0 %v693_v25, %s2679_s27 }
 0x845   :  { %v696_v26 = vpop.permute.xlu1 %695 }
 0x846   :  { %2204 = vmatmul.mubr.msk.f32.vlgmr.msra.gmra.mrb[4].mxu1 %vm176_vm3, %v696_v26 }
 0x847   :  { %2433 = vmatpush3.bf16.msra.mxu1 %v2770_v34  ;;  %2222 = vmatprep.mubr.msk.f32.mxu1 %vm2677_vm2, %v2678_v8 }
 0x848   :  { %2434 = vmatprep.subr.bf16.mxu1 %v2676_v0 }
 0x84b   :  { %2436 = vmatpush3.bf16.msra.mxu1 %v2787_v39 }
 0x84c   :  { %2437 = vmatprep.subr.bf16.mxu1 %v2676_v0 }
 0x84f   :  { %2439 = vmatpush3.bf16.msra.mxu1 %v2805_v44 }
 0x850   :  { %2440 = vmatprep.subr.bf16.mxu1 %v2676_v0 }
 0x853   :  { %2442 = vmatpush3.bf16.msra.mxu1 %v2821_v49 }
 0x854   :  { %2461 = vmatprep.subr.bf16.mxu1 %v2676_v0 }
 0x855   :  { %v797_v27 = vpop.permute.xlu0 %796 }
 0x856   :  { %v799_v28 = vsel %vm176_vm3, %v696_v26, %v797_v27 }
 0x857   :  { %2223 = vmatmul.mubr.msk.f32.vlgmr.msra.gmra.mrb[6].mxu1 %vm389_vm4, %v799_v28 }
 0x858   :  { %2463 = vmatpush3.bf16.msra.mxu1 %v2707_v4  ;;  %2263 = vmatprep.mubr.msk.f32.mxu1 %vm2677_vm2, %v2678_v8 }
 0x859   :  { %2464 = vmatprep.subr.bf16.mxu1 %v2676_v0 }
 0x85c   :  { %2466 = vmatpush3.bf16.msra.mxu1 %v2728_v10 }
 0x85d   :  { %2467 = vmatprep.subr.bf16.mxu1 %v2676_v0 }
 0x919   :  { %v765_v31 = vpop.f32.mrb[4].mxu1 }
 0x91a   :  { %v769_v32 = vadd.f32 %v765_v31, %v144_v29  ;;  %v2205_v33 = vpop.f32.mrb[5].mxu1 }
 0x91c   :  { %2586 = vtanh.f32 %v769_v32  ;;  %v1955_v40 = vmul.f32 -1.442695, %v769_v32 }
 0x926   :  { %v2587_v35 = vpop.eup %2586 }
 0x927   :  { %779 = vrot.lane.b32.xlu1 %v2587_v35, %s2679_s27 }
 0x92a   :  { %v869_v36 = vpop.f32.mrb[6].mxu1 }
 0x92b   :  { %v870_v37 = vadd.f32 %v2865_v63, %v869_v36  ;;  %v2224_v30 = vpop.f32.mrb[7].mxu1 }
 0x92d   :  { %2588 = vtanh.f32 %v870_v37  ;;  %v1957_v53 = vmul.f32 -1.442695, %v870_v37 }
 0x92e   :  { %2590 = vpow2.f32 %v1955_v40 }
 0x937   :  { %v2589_v38 = vpop.eup %2588 }
 0x938   :  { %882 = vrot.lane.b32.xlu0 %v2589_v38, %s2679_s27  ;;  %v2591_v41 = vpop.eup %2590 }
 0x939   :  { %v773_v42 = vadd.f32 1.0, %v2591_v41 }
 0x93b   :  { %2592 = vrcp.f32 %v773_v42 }
 0x93c   :  { %2594 = vpow2.f32 %v1957_v53 }
 0x945   :  { %v2593_v43 = vpop.eup %2592 }
 0x946   :  { %v2595_v45 = vpop.eup %2594  ;;  %v777_v59 = vmul.f32 %v2593_v43, %v2914_v16 }
 0x947   :  { %v876_v48 = vadd.f32 1.0, %v2595_v45 }
 0x949   :  { %2596 = vrcp.f32 %v876_v48 }
 0x953   :  { %v2597_v50 = vpop.eup %2596 }
 0x954   :  { %v880_v1 = vmul.f32 %v2597_v50, %v2919_v20 }
 0x999   :  { %v780_v46 = vpop.permute.xlu1 %779 }
 0x99a   :  { %v782_v47 = vmul.f32 %v2593_v43, %v780_v46 }
 0x99c   :  { %784 = vrot.lane.b32.xlu1 %v782_v47, %s2680_s30 }
 0x9aa   :  { %v883_v51 = vpop.permute.xlu0 %882 }
 0x9ab   :  { %v885_v52 = vmul.f32 %v2597_v50, %v883_v51 }
 0x9ad   :  { %887 = vrot.lane.b32.xlu0 %v885_v52, %s2680_s30 }
 0xa0e   :  { %v785_v60 = vpop.permute.xlu1 %784 }
 0xa0f   :  { %v2952_v61 = vadd.f32 %v785_v60, %v777_v59  ;;  %v154_v59 = vadd.f32 %v2837_v55, %v2749_v13 }
 0xa11   :  { %2598 = vtanh.f32 %v2952_v61 }
 0xa1b   :  { %v2599_v62 = vpop.eup %2598 }
 0xa1c   :  { %790 = vrot.lane.b32.xlu1 %v2599_v62, %s2679_s27 }
 0xa1f   :  { %v888_v54 = vpop.permute.xlu0 %887 }
 0xa20   :  { %v2957_v2 = vadd.f32 %v888_v54, %v880_v1 }
 0xa22   :  { %2600 = vtanh.f32 %v2957_v2 }
 0xa2c   :  { %v2601_v3 = vpop.eup %2600 }
 0xa2d   :  { %893 = vrot.lane.b32.xlu0 %v2601_v3, %s2679_s27 }
 0xa8e   :  { %v791_v5 = vpop.permute.xlu1 %790 }
 0xa8f   :  { %v793_v6 = vmul.f32 %v2593_v43, %v791_v5 }
 0xa91   :  { %898 = vrot.lane.b32.xlu1 %v793_v6, %s2680_s30 }
 0xa9f   :  { %v894_v7 = vpop.permute.xlu0 %893 }
 0xaa0   :  { %v896_v9 = vmul.f32 %v2597_v50, %v894_v7 }
 0xaa2   :  { %999 = vrot.lane.b32.xlu0 %v896_v9, %s2679_s27 }
 0xb03   :  { %v899_v11 = vpop.permute.xlu1 %898 }
 0xb04   :  { %2234 = vmatmul.mubr.msk.f32.vlgmr.msra.gmra.mrb[14].mxu0 %vm176_vm3, %v899_v11 }
 0xb05   :  { %2451 = vmatpush3.bf16.msra.mxu0 %v2770_v34  ;;  %2252 = vmatprep.mubr.msk.f32.mxu0 %vm2677_vm2, %v2678_v8 }
 0xb06   :  { %2452 = vmatprep.subr.bf16.mxu0 %v2676_v0 }
 0xb09   :  { %2454 = vmatpush3.bf16.msra.mxu0 %v2787_v39 }
 0xb0a   :  { %2455 = vmatprep.subr.bf16.mxu0 %v2676_v0 }
 0xb0d   :  { %2457 = vmatpush3.bf16.msra.mxu0 %v2805_v44 }
 0xb0e   :  { %2458 = vmatprep.subr.bf16.mxu0 %v2676_v0 }
 0xb11   :  { %2460 = vmatpush3.bf16.msra.mxu0 %v2821_v49 }
 0xb12   :  { %2479 = vmatprep.subr.bf16.mxu0 %v2676_v0 }
 0xb14   :  { %v1000_v12 = vpop.permute.xlu0 %999 }
 0xb15   :  { %v1002_v14 = vsel %vm176_vm3, %v899_v11, %v1000_v12 }
 0xb16   :  { %2253 = vmatmul.mubr.msk.f32.vlgmr.msra.gmra.mrb[16].mxu0 %vm389_vm4, %v1002_v14 }
 0xb17   :  { %2481 = vmatpush3.bf16.msra.mxu0 %v2707_v4  ;;  %2293 = vmatprep.mubr.msk.f32.mxu0 %vm2677_vm2, %v2678_v8 }
 0xb18   :  { %2482 = vmatprep.subr.bf16.mxu0 %v2676_v0 }
 0xb1b   :  { %2484 = vmatpush3.bf16.msra.mxu0 %v2728_v10 }
 0xb1c   :  { %2485 = vmatprep.subr.bf16.mxu0 %v2676_v0 }
 0xbd7   :  { %v968_v16 = vpop.f32.mrb[14].mxu0 }
 0xbd8   :  { %v972_v17 = vadd.f32 %v968_v16, %v149_v15  ;;  %v2235_v18 = vpop.f32.mrb[15].mxu0 }
 0xbda   :  { %2602 = vtanh.f32 %v972_v17  ;;  %v1959_v24 = vmul.f32 -1.442695, %v972_v17 }
 0xbe4   :  { %v2603_v19 = vpop.eup %2602 }
 0xbe5   :  { %982 = vrot.lane.b32.xlu1 %v2603_v19, %s2679_s27 }
 0xbe9   :  { %v1072_v20 = vpop.f32.mrb[16].mxu0 }
 0xbea   :  { %v1073_v21 = vadd.f32 %v2865_v63, %v1072_v20  ;;  %v2254_v22 = vpop.f32.mrb[17].mxu0 }
 0xbec   :  { %2604 = vtanh.f32 %v1073_v21  ;;  %v1961_v56 = vmul.f32 -1.442695, %v1073_v21 }
 0xbed   :  { %2606 = vpow2.f32 %v1959_v24 }
 0xbf6   :  { %v2605_v23 = vpop.eup %2604 }
 0xbf7   :  { %1085 = vrot.lane.b32.xlu0 %v2605_v23, %s2679_s27  ;;  %v2607_v25 = vpop.eup %2606 }
 0xbf8   :  { %v976_v26 = vadd.f32 1.0, %v2607_v25 }
 0xbfa   :  { %2608 = vrcp.f32 %v976_v26 }
 0xbfb   :  { %2610 = vpow2.f32 %v1961_v56 }
 0xc04   :  { %v2609_v27 = vpop.eup %2608 }
 0xc05   :  { %v2611_v29 = vpop.eup %2610  ;;  %v980_v37 = vmul.f32 %v2609_v27, %v2952_v61 }
 0xc06   :  { %v1079_v32 = vadd.f32 1.0, %v2611_v29 }
 0xc08   :  { %2612 = vrcp.f32 %v1079_v32 }
 0xc12   :  { %v2613_v33 = vpop.eup %2612 }
 0xc13   :  { %v1083_v41 = vmul.f32 %v2613_v33, %v2957_v2 }
 0xc57   :  { %v983_v28 = vpop.permute.xlu1 %982 }
 0xc58   :  { %v985_v31 = vmul.f32 %v2609_v27, %v983_v28 }
 0xc5a   :  { %987 = vrot.lane.b32.xlu1 %v985_v31, %s2680_s30 }
 0xc69   :  { %v1086_v35 = vpop.permute.xlu0 %1085 }
 0xc6a   :  { %v1088_v36 = vmul.f32 %v2613_v33, %v1086_v35 }
 0xc6c   :  { %1090 = vrot.lane.b32.xlu0 %v1088_v36, %s2680_s30 }
 0xccc   :  { %v988_v30 = vpop.permute.xlu1 %987 }
 0xccd   :  { %v2990_v38 = vadd.f32 %v988_v30, %v980_v37 }
 0xccf   :  { %2614 = vtanh.f32 %v2990_v38 }
 0xcd9   :  { %v2615_v40 = vpop.eup %2614 }
 0xcda   :  { %993 = vrot.lane.b32.xlu1 %v2615_v40, %s2679_s27 }
 0xcde   :  { %v1091_v42 = vpop.permute.xlu0 %1090 }
 0xcdf   :  { %v2995_v53 = vadd.f32 %v1091_v42, %v1083_v41 }
 0xce1   :  { %2616 = vtanh.f32 %v2995_v53 }
 0xceb   :  { %v2617_v43 = vpop.eup %2616 }
 0xcec   :  { %1096 = vrot.lane.b32.xlu0 %v2617_v43, %s2679_s27 }
 0xd4c   :  { %v994_v45 = vpop.permute.xlu1 %993 }
 0xd4d   :  { %v996_v46 = vmul.f32 %v2609_v27, %v994_v45 }
 0xd4f   :  { %1101 = vrot.lane.b32.xlu1 %v996_v46, %s2680_s30 }
 0xd5e   :  { %v1097_v47 = vpop.permute.xlu0 %1096 }
 0xd5f   :  { %v1099_v48 = vmul.f32 %v2613_v33, %v1097_v47  ;;  %v159_v33 = vadd.f32 %v2749_v13, %v2843_v58 }
 0xd61   :  { %1202 = vrot.lane.b32.xlu0 %v1099_v48, %s2679_s27 }
 0xdc1   :  { %v1102_v50 = vpop.permute.xlu1 %1101 }
 0xdc2   :  { %2264 = vmatmul.mubr.msk.f32.vlgmr.msra.gmra.mrb[8].mxu1 %vm176_vm3, %v1102_v50 }
 0xdc3   :  { %2469 = vmatpush3.bf16.msra.mxu1 %v2770_v34  ;;  %2282 = vmatprep.mubr.msk.f32.mxu1 %vm2677_vm2, %v2678_v8 }
 0xdc4   :  { %2470 = vmatprep.subr.bf16.mxu1 %v2676_v0 }
 0xdc7   :  { %2472 = vmatpush3.bf16.msra.mxu1 %v2787_v39 }
 0xdc8   :  { %2473 = vmatprep.subr.bf16.mxu1 %v2676_v0 }
 0xdcb   :  { %2475 = vmatpush3.bf16.msra.mxu1 %v2805_v44 }
 0xdcc   :  { %2476 = vmatprep.subr.bf16.mxu1 %v2676_v0 }
 0xdcf   :  { %2478 = vmatpush3.bf16.msra.mxu1 %v2821_v49 }
 0xdd0   :  { %2497 = vmatprep.subr.bf16.mxu1 %v2676_v0 }
 0xdd3   :  { %v1203_v51 = vpop.permute.xlu0 %1202 }
 0xdd4   :  { %v1205_v52 = vsel %vm176_vm3, %v1102_v50, %v1203_v51 }
 0xdd5   :  { %2283 = vmatmul.mubr.msk.f32.vlgmr.msra.gmra.mrb[10].mxu1 %vm389_vm4, %v1205_v52 }
 0xdd6   :  { %2499 = vmatpush3.bf16.msra.mxu1 %v2707_v4  ;;  %2323 = vmatprep.mubr.msk.f32.mxu1 %vm2677_vm2, %v2678_v8 }
 0xdd7   :  { %2500 = vmatprep.subr.bf16.mxu1 %v2676_v0 }
 0xdda   :  { %2502 = vmatpush3.bf16.msra.mxu1 %v2728_v10 }
 0xddb   :  { %2503 = vmatprep.subr.bf16.mxu1 %v2676_v0 }
 0xe95   :  { %v1171_v60 = vpop.f32.mrb[8].mxu1 }
 0xe96   :  { %v1175_v61 = vadd.f32 %v1171_v60, %v154_v59  ;;  %v2265_v62 = vpop.f32.mrb[9].mxu1 }
 0xe98   :  { %2618 = vtanh.f32 %v1175_v61  ;;  %v1963_v10 = vmul.f32 -1.442695, %v1175_v61 }
 0xea2   :  { %v2619_v1 = vpop.eup %2618 }
 0xea3   :  { %1185 = vrot.lane.b32.xlu1 %v2619_v1, %s2679_s27 }
 0xea8   :  { %v1275_v4 = vpop.f32.mrb[10].mxu1 }
 0xea9   :  { %v1276_v54 = vadd.f32 %v2865_v63, %v1275_v4  ;;  %v2284_v2 = vpop.f32.mrb[11].mxu1 }
 0xeab   :  { %2620 = vtanh.f32 %v1276_v54  ;;  %v1965_v55 = vmul.f32 -1.442695, %v1276_v54 }
 0xeac   :  { %2622 = vpow2.f32 %v1963_v10 }
 0xeb5   :  { %v2621_v3 = vpop.eup %2620 }
 0xeb6   :  { %1288 = vrot.lane.b32.xlu0 %v2621_v3, %s2679_s27  ;;  %v2623_v5 = vpop.eup %2622 }
 0xeb7   :  { %v1179_v6 = vadd.f32 1.0, %v2623_v5 }
 0xeb9   :  { %2624 = vrcp.f32 %v1179_v6 }
 0xeba   :  { %2626 = vpow2.f32 %v1965_v55 }
 0xec3   :  { %v2625_v7 = vpop.eup %2624 }
 0xec4   :  { %v2627_v12 = vpop.eup %2626  ;;  %v1183_v18 = vmul.f32 %v2625_v7, %v2990_v38 }
 0xec5   :  { %v1282_v14 = vadd.f32 1.0, %v2627_v12 }
 0xec7   :  { %2628 = vrcp.f32 %v1282_v14 }
 0xed1   :  { %v2629_v15 = vpop.eup %2628 }
 0xed2   :  { %v1286_v22 = vmul.f32 %v2629_v15, %v2995_v53 }
 0xf15   :  { %v1186_v9 = vpop.permute.xlu1 %1185 }
 0xf16   :  { %v1188_v11 = vmul.f32 %v2625_v7, %v1186_v9 }
 0xf18   :  { %1190 = vrot.lane.b32.xlu1 %v1188_v11, %s2680_s30 }
 0xf28   :  { %v1289_v16 = vpop.permute.xlu0 %1288 }
 0xf29   :  { %v1291_v17 = vmul.f32 %v2629_v15, %v1289_v16 }
 0xf2b   :  { %1293 = vrot.lane.b32.xlu0 %v1291_v17, %s2680_s30 }
 0xf8a   :  { %v1191_v19 = vpop.permute.xlu1 %1190 }
 0xf8b   :  { %v3028_v20 = vadd.f32 %v1191_v19, %v1183_v18 }
 0xf8d   :  { %2630 = vtanh.f32 %v3028_v20 }
 0xf97   :  { %v2631_v21 = vpop.eup %2630 }
 0xf98   :  { %1196 = vrot.lane.b32.xlu1 %v2631_v21, %s2679_s27 }
 0xf9d   :  { %v1294_v23 = vpop.permute.xlu0 %1293 }
 0xf9e   :  { %v3033_v24 = vadd.f32 %v1294_v23, %v1286_v22 }
 0xfa0   :  { %2632 = vtanh.f32 %v3033_v24 }
 0xfaa   :  { %v2633_v25 = vpop.eup %2632 }
 0xfab   :  { %1299 = vrot.lane.b32.xlu0 %v2633_v25, %s2679_s27 }
0x100a   :  { %v1197_v26 = vpop.permute.xlu1 %1196 }
0x100b   :  { %v1199_v56 = vmul.f32 %v2625_v7, %v1197_v26 }
0x100d   :  { %1304 = vrot.lane.b32.xlu1 %v1199_v56, %s2680_s30 }
0x101d   :  { %v1300_v27 = vpop.permute.xlu0 %1299 }
0x101e   :  { %v1302_v28 = vmul.f32 %v2629_v15, %v1300_v27 }
0x1020   :  { %1405 = vrot.lane.b32.xlu0 %v1302_v28, %s2679_s27 }
0x107f   :  { %v1305_v29 = vpop.permute.xlu1 %1304 }
0x1080   :  { %2294 = vmatmul.mubr.msk.f32.vlgmr.msra.gmra.mrb[18].mxu0 %vm176_vm3, %v1305_v29 }
0x1081   :  { %2487 = vmatpush3.bf16.msra.mxu0 %v2770_v34  ;;  %2312 = vmatprep.mubr.msk.f32.mxu0 %vm2677_vm2, %v2678_v8 }
0x1082   :  { %2488 = vmatprep.subr.bf16.mxu0 %v2676_v0 }
0x1085   :  { %2490 = vmatpush3.bf16.msra.mxu0 %v2787_v39 }
0x1086   :  { %2491 = vmatprep.subr.bf16.mxu0 %v2676_v0 }
0x1089   :  { %2493 = vmatpush3.bf16.msra.mxu0 %v2805_v44 }
0x108a   :  { %2494 = vmatprep.subr.bf16.mxu0 %v2676_v0 }
0x108d   :  { %2496 = vmatpush3.bf16.msra.mxu0 %v2821_v49 }
0x108e   :  { %2515 = vmatprep.subr.bf16.mxu0 %v2676_v0 }
0x1092   :  { %v1406_v31 = vpop.permute.xlu0 %1405 }
0x1093   :  { %v1408_v32 = vsel %vm176_vm3, %v1305_v29, %v1406_v31 }
0x1094   :  { %2313 = vmatmul.mubr.msk.f32.vlgmr.msra.gmra.mrb[20].mxu0 %vm389_vm4, %v1408_v32 }
0x1095   :  { %2517 = vmatpush3.bf16.msra.mxu0 %v2770_v34  ;;  %2361 = vmatprep.mubr.msk.f32.mxu0 %vm2677_vm2, %v2678_v8 }
0x1096   :  { %2518 = vmatprep.subr.bf16.mxu0 %v2676_v0 }
0x1099   :  { %2520 = vmatpush3.bf16.msra.mxu0 %v2787_v39 }
0x109a   :  { %2521 = vmatprep.subr.bf16.mxu0 %v2676_v0 }
0x109d   :  { %2523 = vmatpush3.bf16.msra.mxu0 %v2805_v44 }
0x109e   :  { %2524 = vmatprep.subr.bf16.mxu0 %v2676_v0 }
0x10a1   :  { %2526 = vmatpush3.bf16.msra.mxu0 %v2821_v49 }
0x1153   :  { %v1374_v35 = vpop.f32.mrb[18].mxu0 }
0x1154   :  { %v1378_v36 = vadd.f32 %v1374_v35, %v159_v33  ;;  %v2295_v37 = vpop.f32.mrb[19].mxu0 }
0x1156   :  { %2634 = vtanh.f32 %v1378_v36  ;;  %v1967_v53 = vmul.f32 -1.442695, %v1378_v36 }
0x1160   :  { %v2635_v30 = vpop.eup %2634 }
0x1161   :  { %1388 = vrot.lane.b32.xlu1 %v2635_v30, %s2679_s27 }
0x1167   :  { %v1478_v38 = vpop.f32.mrb[20].mxu0 }
0x1168   :  { %v1479_v40 = vadd.f32 %v2865_v63, %v1478_v38  ;;  %v2314_v41 = vpop.f32.mrb[21].mxu0 }
0x116a   :  { %2636 = vtanh.f32 %v1479_v40  ;;  %v1969_v58 = vmul.f32 -1.442695, %v1479_v40 }
0x116b   :  { %2638 = vpow2.f32 %v1967_v53 }
0x1174   :  { %v2637_v42 = vpop.eup %2636 }
0x1175   :  { %1491 = vrot.lane.b32.xlu0 %v2637_v42, %s2679_s27  ;;  %v2639_v43 = vpop.eup %2638 }
0x1176   :  { %v1382_v45 = vadd.f32 1.0, %v2639_v43 }
0x1178   :  { %2640 = vrcp.f32 %v1382_v45 }
0x1179   :  { %2642 = vpow2.f32 %v1969_v58 }
0x1182   :  { %v2641_v46 = vpop.eup %2640 }
0x1183   :  { %v2643_v50 = vpop.eup %2642  ;;  %v1386_v61 = vmul.f32 %v2641_v46, %v3028_v20 }
0x1184   :  { %v1485_v51 = vadd.f32 1.0, %v2643_v50 }
0x1186   :  { %2644 = vrcp.f32 %v1485_v51 }
0x1190   :  { %v2645_v52 = vpop.eup %2644 }
0x1191   :  { %v1489_v54 = vmul.f32 %v2645_v52, %v3033_v24 }
0x11d3   :  { %v1389_v47 = vpop.permute.xlu1 %1388 }
0x11d4   :  { %v1391_v48 = vmul.f32 %v2641_v46, %v1389_v47 }
0x11d6   :  { %1393 = vrot.lane.b32.xlu1 %v1391_v48, %s2680_s30 }
0x11e7   :  { %v1492_v59 = vpop.permute.xlu0 %1491 }
0x11e8   :  { %v1494_v60 = vmul.f32 %v2645_v52, %v1492_v59 }
0x11ea   :  { %1496 = vrot.lane.b32.xlu0 %v1494_v60, %s2680_s30  ;;  %v2681_v60 = vmov 0  }
0x11eb   :  { %2545 = vset.pattern.permute.xlu0 %v2681_v60 }
0x1248   :  { %v1394_v62 = vpop.permute.xlu1 %1393 }
0x1249   :  { %v1396_v1 = vadd.f32 %v1394_v62, %v1386_v61 }
0x124b   :  { %2646 = vtanh.f32 %v1396_v1 }
0x1255   :  { %v2647_v4 = vpop.eup %2646 }
0x1256   :  { %1399 = vrot.lane.b32.xlu1 %v2647_v4, %s2679_s27  ;;  %v1840_v4 = vld [vmem:[%s3151_s0 + $0x60] sm:$0xff] }
0x125c   :  { %v1497_v2 = vpop.permute.xlu0 %1496 }
0x125d   :  { %v1499_v3 = vadd.f32 %v1497_v2, %v1489_v54  ;;  %v1841_v54 = vld [vmem:[%s3151_s0 + $0x68] sm:$0xff]  ;;  %v1842_v2 = vld [vmem:[%s3151_s0 + $0x70] sm:$0xff] }
0x125f   :  { %2648 = vtanh.f32 %v1499_v3 }
0x1269   :  { %v2649_v10 = vpop.eup %2648 }
0x126a   :  { %1502 = vrot.lane.b32.xlu0 %v2649_v10, %s2679_s27  ;;  %v1843_v10 = vld [vmem:[%s3151_s0 + $0x78] sm:$0xff] }
0x12c8   :  { %v1400_v5 = vpop.permute.xlu1 %1399 }
0x12c9   :  { %v1402_v6 = vmul.f32 %v2641_v46, %v1400_v5  ;;  %v2531_v5 = vpack.c.bf16 %v1843_v10, %v1842_v2 }
0x12cb   :  { %1507 = vrot.lane.b32.xlu1 %v1402_v6, %s2680_s30  ;;  %v1844_v6 = vld [vmem:[%s3151_s0 + $0x80] sm:$0xff] }
0x12dc   :  { %v1503_v55 = vpop.permute.xlu0 %1502 }
0x12dd   :  { %v1505_v7 = vmul.f32 %v2645_v52, %v1503_v55  ;;  %v1845_v55 = vld [vmem:[%s3151_s0 + $0x88] sm:$0xff] }
0x12df   :  { %1608 = vrot.lane.b32.xlu0 %v1505_v7, %s2679_s27  ;;  %v2534_v7 = vpack.c.bf16 %v1845_v55, %v1844_v6 }
0x133d   :  { %v1508_v9 = vpop.permute.xlu1 %1507 }
0x133e   :  { %2324 = vmatmul.mubr.msk.f32.vlgmr.msra.gmra.mrb[12].mxu1 %vm176_vm3, %v1508_v9 }
0x133f   :  { %2505 = vmatpush3.bf16.msra.mxu1 %v2770_v34  ;;  %2342 = vmatprep.mubr.msk.f32.mxu1 %vm2677_vm2, %v2678_v8 }
0x1340   :  { %2506 = vmatprep.subr.bf16.mxu1 %v2676_v0 }
0x1343   :  { %2508 = vmatpush3.bf16.msra.mxu1 %v2787_v39  ;;  %v164_v39 = vadd.f32 %v2841_v57, %v2749_v13 }
0x1344   :  { %2509 = vmatprep.subr.bf16.mxu1 %v2676_v0 }
0x1347   :  { %2511 = vmatpush3.bf16.msra.mxu1 %v2805_v44 }
0x1348   :  { %2512 = vmatprep.subr.bf16.mxu1 %v2676_v0 }
0x134b   :  { %2514 = vmatpush3.bf16.msra.mxu1 %v2821_v49 }
0x134c   :  { %2527 = vmatprep.subr.bf16.mxu1 %v2676_v0 }
0x1351   :  { %v1609_v11 = vpop.permute.xlu0 %1608 }
0x1352   :  { %v1611_v34 = vsel %vm176_vm3, %v1508_v9, %v1609_v11  ;;  %v1846_v11 = vld [vmem:[%s3151_s0 + $0x90] sm:$0xff] }
0x1353   :  { %2343 = vmatmul.mubr.msk.f32.vlgmr.msra.gmra.mrb[14].mxu1 %vm389_vm4, %v1611_v34  ;;  %v1847_v34 = vld [vmem:[%s3151_s0 + $0x98] sm:$0xff] }
0x1354   :  { %2380 = vmatprep.mubr.msk.f32.mxu1 %vm2677_vm2, %v2678_v8 }
0x1411   :  { %v1577_v12 = vpop.f32.mrb[12].mxu1 }
0x1412   :  { %v1581_v14 = vadd.f32 %v1577_v12, %v164_v39  ;;  %v2325_v44 = vpop.f32.mrb[13].mxu1  ;;  %v2537_v39 = vpack.c.bf16 %v1847_v34, %v1846_v11 }
0x1414   :  { %2650 = vtanh.f32 %v1581_v14  ;;  %v1971_v19 = vmul.f32 -1.442695, %v1581_v14 }
0x141e   :  { %v2651_v15 = vpop.eup %2650 }
0x141f   :  { %1591 = vrot.lane.b32.xlu1 %v2651_v15, %s2679_s27  ;;  %v1976_v15 = vld [vmem:[%s3151_s0 + $0xaa] ss:$0 sm:$0xff] }
0x1426   :  { %v1681_v49 = vpop.f32.mrb[14].mxu1 }
0x1427   :  { %v1682_v16 = vadd.f32 %v2865_v63, %v1681_v49  ;;  %v2344_v17 = vpop.f32.mrb[15].mxu1 }
0x1428   :  { %v1977_v17 = vld [vmem:[%s3151_s0 + $0xab] ss:$0 sm:$0xff] }
0x1429   :  { %2652 = vtanh.f32 %v1682_v16  ;;  %v1973_v13 = vmul.f32 -1.442695, %v1682_v16 }
0x142a   :  { %2654 = vpow2.f32 %v1971_v19 }
0x1433   :  { %v2653_v18 = vpop.eup %2652 }
0x1434   :  { %1694 = vrot.lane.b32.xlu0 %v2653_v18, %s2679_s27  ;;  %v2655_v8 = vpop.eup %2654 }
0x1435   :  { %v1585_v20 = vadd.f32 1.0, %v2655_v8 }
0x1437   :  { %2656 = vrcp.f32 %v1585_v20  ;;  %v1978_v20 = vld [vmem:[%s3151_s0 + $0xac] ss:$0 sm:$0xff] }
0x1438   :  { %2658 = vpow2.f32 %v1973_v13 }
0x1441   :  { %v2657_v57 = vpop.eup %2656 }
0x1442   :  { %v2659_v23 = vpop.eup %2658  ;;  %v1589_v27 = vmul.f32 %v2657_v57, %v1396_v1 }
0x1443   :  { %v1688_v24 = vadd.f32 1.0, %v2659_v23 }
0x1445   :  { %2660 = vrcp.f32 %v1688_v24 }
0x144f   :  { %v2661_v25 = vpop.eup %2660 }
0x1450   :  { %v1692_v32 = vmul.f32 %v2661_v25, %v1499_v3  ;;  %v2528_v3 = vpack.c.bf16 %v1841_v54, %v1840_v4 }
0x1452   :  { %2529 = vmatpush3.bf16.msra.mxu1 %v2528_v3 }
0x1453   :  { %2530 = vmatprep.subr.bf16.mxu1 %v2676_v0 }
0x1456   :  { %2532 = vmatpush3.bf16.msra.mxu1 %v2531_v5 }
0x1457   :  { %2533 = vmatprep.subr.bf16.mxu1 %v2676_v0 }
0x145a   :  { %2535 = vmatpush3.bf16.msra.mxu1 %v2534_v7 }
0x145b   :  { %2536 = vmatprep.subr.bf16.mxu1 %v2676_v0 }
0x145e   :  { %2538 = vmatpush3.bf16.msra.mxu1 %v2537_v39 }
0x1491   :  { %v1592_v21 = vpop.permute.xlu1 %1591 }
0x1492   :  { %v1594_v22 = vmul.f32 %v2657_v57, %v1592_v21 }
0x1494   :  { %1596 = vrot.lane.b32.xlu1 %v1594_v22, %s2680_s30 }
0x14a6   :  { %v1695_v26 = vpop.permute.xlu0 %1694 }
0x14a7   :  { %v1697_v56 = vmul.f32 %v2661_v25, %v1695_v26 }
0x14a9   :  { %1699 = vrot.lane.b32.xlu0 %v1697_v56, %s2680_s30 }
0x1506   :  { %v1597_v28 = vpop.permute.xlu1 %1596 }
0x1507   :  { %v1599_v29 = vadd.f32 %v1597_v28, %v1589_v27 }
0x1509   :  { %2662 = vtanh.f32 %v1599_v29 }
0x1513   :  { %v2663_v31 = vpop.eup %2662 }
0x1514   :  { %1602 = vrot.lane.b32.xlu1 %v2663_v31, %s2679_s27 }
0x151b   :  { %v1700_v33 = vpop.permute.xlu0 %1699 }
0x151c   :  { %v1702_v35 = vadd.f32 %v1700_v33, %v1692_v32 }
0x151e   :  { %2664 = vtanh.f32 %v1702_v35 }
0x1528   :  { %v2665_v36 = vpop.eup %2664 }
0x1529   :  { %1705 = vrot.lane.b32.xlu0 %v2665_v36, %s2679_s27 }
0x1586   :  { %v1603_v37 = vpop.permute.xlu1 %1602 }
0x1587   :  { %v1605_v30 = vmul.f32 %v2657_v57, %v1603_v37 }
0x1589   :  { %1710 = vrot.lane.b32.xlu1 %v1605_v30, %s2680_s30 }
0x159b   :  { %v1706_v38 = vpop.permute.xlu0 %1705 }
0x159c   :  { %v1708_v40 = vmul.f32 %v2661_v25, %v1706_v38 }
0x159e   :  { %1714 = vrot.lane.b32.xlu0 %v1708_v40, %s2679_s27 }
0x15fb   :  { %v1711_v41 = vpop.permute.xlu1 %1710 }
0x1610   :  { %v1715_v42 = vpop.permute.xlu0 %1714 }
0x1611   :  { %v1717_v53 = vsel %vm176_vm3, %v1711_v41, %v1715_v42 }
0x1612   :  { %2362 = vmatmul.mubr.msk.f32.vlgmr.msra.gmra.mrb[22].mxu0 %vm389_vm4, %v1717_v53 }
0x16e5   :  { %v1787_v43 = vpop.f32.mrb[22].mxu0 }
0x16e6   :  { %v1788_v45 = vadd.f32 %v2865_v63, %v1787_v43  ;;  %v2363_v58 = vpop.f32.mrb[23].mxu0  ;;  %v1815_v63 = vld [vmem:[%s3152_s1 + $0x60] sm:$0xff] }
0x16e8   :  { %2666 = vtanh.f32 %v1788_v45  ;;  %v1975_v47 = vmul.f32 -1.442695, %v1788_v45 }
0x16ea   :  { %2668 = vpow2.f32 %v1975_v47 }
0x16f2   :  { %v2667_v46 = vpop.eup %2666 }
0x16f3   :  { %1800 = vrot.lane.b32.xlu1 %v2667_v46, %s2679_s27 }
0x16f4   :  { %v2669_v48 = vpop.eup %2668 }
0x16f5   :  { %v1794_v50 = vadd.f32 1.0, %v2669_v48 }
0x16f7   :  { %2670 = vrcp.f32 %v1794_v50 }
0x1701   :  { %v2671_v51 = vpop.eup %2670 }
0x1702   :  { %v1798_v61 = vmul.f32 %v2671_v51, %v1702_v35 }
0x1765   :  { %v1801_v52 = vpop.permute.xlu1 %1800 }
0x1766   :  { %v1803_v59 = vmul.f32 %v2671_v51, %v1801_v52 }
0x1768   :  { %1805 = vrot.lane.b32.xlu0 %v1803_v59, %s2680_s30 }
0x176c   :  { %1820 = vperm.xlu0 %2545, %v1815_v63  }
0x17da   :  { %v1806_v62 = vpop.permute.xlu0 %1805 }
0x17db   :  { %v1808_v1 = vadd.f32 %v1806_v62, %v1798_v61 }
0x17dd   :  { %2672 = vtanh.f32 %v1808_v1 }
0x17e7   :  { %v2673_v9 = vpop.eup %2672 }
0x17e8   :  { %1811 = vrot.lane.b32.xlu1 %v2673_v9, %s2679_s27 }
0x17eb   :  { %v1821_v49 = vpop.permute.xlu0 %1820 }
0x17ec   :  { %v1827_v16 = vmul.f32 %v1976_v15, %v1821_v49 }
0x17ee   :  { %v1832_v18 = vadd.f32 %v1977_v17, %v1827_v16 }
0x17f0   :  { %v1833_v19 = vmax.f32 %v1832_v18, 0.0 }
0x185a   :  { %v1812_v12 = vpop.permute.xlu1 %1811 }
0x185b   :  { %v1814_v14 = vmul.f32 %v2671_v51, %v1812_v12 }
0x185d   :  { %v1834_v44 = vmax.f32 %v1814_v14, 0.0 }
0x185f   :  { %1836 = vrot.lane.b32.xlu1 %v1834_v44, %s2679_s27 }
0x18d1   :  { %v1837_v8 = vpop.permute.xlu1 %1836 }
0x18d2   :  { %v1839_v0 = vsel %vm176_vm3, %v1833_v19, %v1837_v8 }
0x18d3   :  { %2381 = vmatmul.mubr.msk.f32.vlgmr.msra.gmra.mrb[16].mxu1 %vm389_vm4, %v1839_v0 }
0x19a6   :  { %v1922_v13 = vpop.f32.mrb[16].mxu1 }
0x19a7   :  { %v1923_v57 = vadd.f32 %v1978_v20, %v1922_v13  ;;  %v2382_v21 = vpop.f32.mrb[17].mxu1 }
0x19a9   :  { %2674 = vtanh.f32 %v1923_v57 }
0x19b3   :  { %v2675_v22 = vpop.eup %2674 }
0x19b4   :  { %1928 = vst.msk [vmem:[%s3153_s2] sm:$0xff] %vm1927_vm5, %v2675_v22 }

</bundles_post_ra>
